<compile_context>
chip_gen: v6e
topology: v6e:2x2x1
jax: 0.10.0
libtpu: 0.0.40
codegen_flags: <defaults>
</compile_context>

<pallas_src>
import math
import functools

import jax
import jax.numpy as jnp
from jax import lax
from jax.experimental import pallas as pl
from jax.experimental.pallas import tpu as pltpu

LN_EPS = 1e-5
GELU_C = math.sqrt(2.0 / math.pi)
NEG_MASK = -10000.0          # matches HF GPT-2 masked_bias semantics


def _detect_big_vmem():
    """True on generations with 128 MiB VMEM/core (v5e/v5p/v6e)."""
    try:
        kind = jax.devices()[0].device_kind.lower()
    except Exception:
        return False
    return ("v5" in kind) or ("v6" in kind)


_BIG_VMEM = _detect_big_vmem()
# Conservative cap sized against v7x's 64 MiB physical VMEM; raised on
# v5e/v6e (128 MiB physical) so bigger M tiles can kill weight re-streaming.
VMEM_LIMIT = (100 if _BIG_VMEM else 48) * 1024 * 1024


# ----------------------------------------------------------------------------
# Tile-size helpers (respect the (8, 128) block constraint: a block dim must
# be a multiple of 8 (sublane) / 128 (lane) or equal the full array dim).
# ----------------------------------------------------------------------------
def _tile_last(dim, target):
    """Lane (minor) block dim: largest multiple of 128 <= target dividing dim."""
    t = min(target, dim)
    t = (t // 128) * 128
    while t >= 128:
        if dim % t == 0:
            return t
        t -= 128
    return dim  # fall back to the full dim (always legal)


def _tile_sub(dim, target):
    """Sublane (second-minor) block dim: largest multiple of 8 <= target dividing dim."""
    t = min(target, dim)
    t = (t // 8) * 8
    while t >= 8:
        if dim % t == 0:
            return t
        t -= 8
    return dim


def _round_up(n, mult):
    return ((n + mult - 1) // mult) * mult


# ----------------------------------------------------------------------------
# Fused q/k/v projection: one pallas_call, three outputs, x read from HBM once
# and cast to bf16 in-kernel.  Full-K contraction (K = E), no k grid axis.
# ----------------------------------------------------------------------------
def _qkv_kernel(x_ref, wq_ref, wk_ref, wv_ref, bq_ref, bk_ref, bv_ref,
                q_ref, k_ref, v_ref):
    x = x_ref[...].astype(wq_ref.dtype)          # f32 -> bf16 inside the kernel
    q_ref[...] = (jnp.dot(x, wq_ref[...], preferred_element_type=jnp.float32)
                  + bq_ref[...]).astype(q_ref.dtype)
    k_ref[...] = (jnp.dot(x, wk_ref[...], preferred_element_type=jnp.float32)
                  + bk_ref[...]).astype(k_ref.dtype)
    v_ref[...] = (jnp.dot(x, wv_ref[...], preferred_element_type=jnp.float32)
                  + bv_ref[...]).astype(v_ref.dtype)


def pallas_qkv_proj(x, wq, wk, wv, bq, bk, bv, *, tm=None, tn=512):
    M, E = x.shape
    if tm is None:
        tm = 512 if _BIG_VMEM else 256
    tm = _tile_sub(M, tm)
    tn = _tile_last(E, tn)
    grid = (M // tm, E // tn)

    w_spec = pl.BlockSpec((E, tn), lambda i, j: (0, j))
    b_spec = pl.BlockSpec((1, tn), lambda i, j: (0, j))
    o_spec = pl.BlockSpec((tm, tn), lambda i, j: (i, j))
    o_shape = jax.ShapeDtypeStruct((M, E), jnp.bfloat16)

    return pl.pallas_call(
        _qkv_kernel,
        grid=grid,
        in_specs=[pl.BlockSpec((tm, E), lambda i, j: (i, 0)),
                  w_spec, w_spec, w_spec, b_spec, b_spec, b_spec],
        out_specs=(o_spec, o_spec, o_spec),
        out_shape=(o_shape, o_shape, o_shape),
        compiler_params=pltpu.CompilerParams(
            dimension_semantics=("parallel", "parallel"),
            vmem_limit_bytes=VMEM_LIMIT,
        ),
    )(x, wq, wk, wv,
      bq.reshape(1, E).astype(jnp.float32),
      bk.reshape(1, E).astype(jnp.float32),
      bv.reshape(1, E).astype(jnp.float32))


# ----------------------------------------------------------------------------
# Full-K tiled matmul + bias (optionally + residual fused into the epilogue).
# Used for c_proj, where the "mlp + attn" add is fused into the store.
# ----------------------------------------------------------------------------
def _matmul_bias_kernel(x_ref, w_ref, b_ref, o_ref):
    x = x_ref[...].astype(w_ref.dtype)
    o_ref[...] = (jnp.dot(x, w_ref[...], preferred_element_type=jnp.float32)
                  + b_ref[...]).astype(o_ref.dtype)


def _matmul_bias_res_kernel(x_ref, w_ref, b_ref, r_ref, o_ref):
    x = x_ref[...].astype(w_ref.dtype)
    acc = jnp.dot(x, w_ref[...], preferred_element_type=jnp.float32)
    o_ref[...] = (acc + b_ref[...]
                  + r_ref[...].astype(jnp.float32)).astype(o_ref.dtype)


def pallas_matmul_bias(x, w, b, *, out_dtype=jnp.float32, residual=None,
                       tm=None, tn=512):
    M, K = x.shape
    Kw, N = w.shape
    assert K == Kw
    if tm is None:
        tm = 512 if _BIG_VMEM else 256
    tm = _tile_sub(M, tm)
    tn = _tile_last(N, tn)
    grid = (M // tm, N // tn)

    in_specs = [pl.BlockSpec((tm, K), lambda i, j: (i, 0)),
                pl.BlockSpec((K, tn), lambda i, j: (0, j)),
                pl.BlockSpec((1, tn), lambda i, j: (0, j))]
    args = [x, w, b.reshape(1, N).astype(jnp.float32)]
    kernel = _matmul_bias_kernel
    if residual is not None:
        in_specs.append(pl.BlockSpec((tm, tn), lambda i, j: (i, j)))
        args.append(residual)
        kernel = _matmul_bias_res_kernel

    return pl.pallas_call(
        kernel,
        grid=grid,
        in_specs=in_specs,
        out_specs=pl.BlockSpec((tm, tn), lambda i, j: (i, j)),
        out_shape=jax.ShapeDtypeStruct((M, N), out_dtype),
        compiler_params=pltpu.CompilerParams(
            dimension_semantics=("parallel", "parallel"),
            vmem_limit_bytes=VMEM_LIMIT,
        ),
    )(*args)


# ----------------------------------------------------------------------------
# Fused LayerNorm -> Conv1D(E,4E) -> GELU -> Conv1D(4E,E), tiled over rows (M)
# and the 4E hidden dim (reduction for the second matmul).  LN computed once
# per row tile (h == 0) and cached as a bf16 MXU input.
# ----------------------------------------------------------------------------
def _ln_mlp_kernel(x_ref, g_ref, be_ref, w1_ref, b1_ref, w2_ref, b2_ref,
                   o_ref, acc_ref, xn_ref):
    h = pl.program_id(1)

    @pl.when(h == 0)
    def _():
        x = x_ref[...].astype(jnp.float32)
        mean = jnp.mean(x, axis=-1, keepdims=True)
        var = jnp.mean(jnp.square(x - mean), axis=-1, keepdims=True)
        xn = (x - mean) * lax.rsqrt(var + LN_EPS) * g_ref[...] + be_ref[...]
        xn_ref[...] = xn.astype(xn_ref.dtype)      # bf16 MXU input, f32 stats
        acc_ref[...] = jnp.zeros_like(acc_ref)

    h1 = jnp.dot(xn_ref[...], w1_ref[...], preferred_element_type=jnp.float32)
    h1 = h1 + b1_ref[...]
    h1 = 0.5 * h1 * (1.0 + jnp.tanh(GELU_C * (h1 + 0.044715 * (h1 ** 3))))
    acc_ref[...] += jnp.dot(h1.astype(w2_ref.dtype), w2_ref[...],
                            preferred_element_type=jnp.float32)

    @pl.when(h == pl.num_programs(1) - 1)
    def _():
        o_ref[...] = (acc_ref[...] + b2_ref[...]).astype(o_ref.dtype)


def pallas_ln_mlp(x, gamma, beta, w1, b1, w2, b2, *, tm=None, th=512):
    M, E = x.shape
    _, H4 = w1.shape
    if tm is None:
        # bigger row tiles cut fc1/fc2 weight re-streaming; keep moderate on v7x
        tm = 1024 if _BIG_VMEM else 512
    tm = _tile_sub(M, tm)
    th = _tile_last(H4, th)
    grid = (M // tm, H4 // th)
    return pl.pallas_call(
        _ln_mlp_kernel,
        grid=grid,
        in_specs=[
            pl.BlockSpec((tm, E), lambda i, h: (i, 0)),
            pl.BlockSpec((1, E), lambda i, h: (0, 0)),
            pl.BlockSpec((1, E), lambda i, h: (0, 0)),
            pl.BlockSpec((E, th), lambda i, h: (0, h)),
            pl.BlockSpec((1, th), lambda i, h: (0, h)),
            pl.BlockSpec((th, E), lambda i, h: (h, 0)),
            pl.BlockSpec((1, E), lambda i, h: (0, 0)),
        ],
        out_specs=pl.BlockSpec((tm, E), lambda i, h: (i, 0)),
        out_shape=jax.ShapeDtypeStruct((M, E), jnp.float32),
        scratch_shapes=[pltpu.VMEM((tm, E), jnp.float32),     # f32 accumulator
                        pltpu.VMEM((tm, E), jnp.bfloat16)],   # normalized rows
        compiler_params=pltpu.CompilerParams(
            dimension_semantics=("parallel", "arbitrary"),
            vmem_limit_bytes=VMEM_LIMIT,
        ),
    )(x, gamma.reshape(1, E), beta.reshape(1, E),
      w1, b1.reshape(1, H4), w2, b2.reshape(1, E))


# ----------------------------------------------------------------------------
# Causal multi-head attention.  One (batch, q-tile) per grid step, all heads
# handled in-kernel via static lane slices; the 1/sqrt(d) scale is folded into
# q once, the causal mask is built once, and each head's output goes straight
# into a (tq, E) f32 VMEM scratch slice so only one head is ever live in vregs.
# The merged-head result is written with a single lane-dense store.
# ----------------------------------------------------------------------------
def _attention_kernel(q_ref, k_ref, v_ref, o_ref, o_acc, *, num_heads):
    tq, E = q_ref.shape[1], q_ref.shape[2]
    S = k_ref.shape[1]
    d_head = E // num_heads
    scale = 1.0 / math.sqrt(d_head)

    # fold the scale into q once ((tq,E) work instead of (tq,S) per head)
    q = (q_ref[0].astype(jnp.float32) * scale).astype(k_ref.dtype)
    k = k_ref[0]                         # (S, E) bf16
    v = v_ref[0]                         # (S, E) bf16

    row = pl.program_id(1) * tq + lax.broadcasted_iota(jnp.int32, (tq, S), 0)
    col = lax.broadcasted_iota(jnp.int32, (tq, S), 1)
    causal = col <= row

    for h in range(num_heads):
        lo = h * d_head
        qh = q[:, lo:lo + d_head]
        kh = k[:, lo:lo + d_head]
        vh = v[:, lo:lo + d_head]
        # contract the head dims directly (no k.T materialized)
        s = lax.dot_general(qh, kh, (((1,), (1,)), ((), ())),
                            preferred_element_type=jnp.float32)
        s = jnp.where(causal, s, jnp.float32(NEG_MASK))
        s = s - jnp.max(s, axis=-1, keepdims=True)
        p = jnp.exp(s)
        p = p / jnp.sum(p, axis=-1, keepdims=True)
        o_acc[:, lo:lo + d_head] = jnp.dot(p.astype(vh.dtype), vh,
                                           preferred_element_type=jnp.float32)
    # TODO(synk): for S >= 2048 (beyond GPT-2's 1024 positions) add a kv grid
    # axis with flash-style online softmax; also consider batching the per-head
    # d=64 dots to fill the 256-wide MXU on v6e/v7x.
    o_ref[0] = o_acc[...].astype(o_ref.dtype)


def pallas_attention(q, k, v, *, num_heads, tq=256):
    B, S, E = q.shape
    assert E % num_heads == 0
    tq = _tile_sub(S, tq)
    grid = (B, S // tq)
    q_spec = pl.BlockSpec((1, tq, E), lambda b, i: (b, i, 0))
    kv_spec = pl.BlockSpec((1, S, E), lambda b, i: (b, 0, 0))
    return pl.pallas_call(
        functools.partial(_attention_kernel, num_heads=num_heads),
        grid=grid,
        in_specs=[q_spec, kv_spec, kv_spec],
        out_specs=pl.BlockSpec((1, tq, E), lambda b, i: (b, i, 0)),
        out_shape=jax.ShapeDtypeStruct((B, S, E), jnp.bfloat16),
        scratch_shapes=[pltpu.VMEM((tq, E), jnp.float32)],
        compiler_params=pltpu.CompilerParams(
            dimension_semantics=("parallel", "parallel"),
            vmem_limit_bytes=VMEM_LIMIT,
        ),
    )(q, k, v)


# ----------------------------------------------------------------------------
# Final LayerNorm fused into the (no-bias) lm_head matmul.  LN is computed only
# on the first vocab tile (j == 0) and cached in a bf16 scratch; the vocab dim
# of the weight is padded to a multiple of 128 so it always stays tiled.
# ----------------------------------------------------------------------------
def _ln_lm_head_kernel(x_ref, g_ref, be_ref, w_ref, o_ref, xn_ref):
    j = pl.program_id(1)

    @pl.when(j == 0)
    def _():
        x = x_ref[...].astype(jnp.float32)
        mean = jnp.mean(x, axis=-1, keepdims=True)
        var = jnp.mean(jnp.square(x - mean), axis=-1, keepdims=True)
        xn = (x - mean) * lax.rsqrt(var + LN_EPS) * g_ref[...] + be_ref[...]
        xn_ref[...] = xn.astype(xn_ref.dtype)

    o_ref[...] = jnp.dot(xn_ref[...], w_ref[...],
                         preferred_element_type=jnp.float32).astype(o_ref.dtype)


def pallas_ln_lm_head(x, gamma, beta, w, *, vocab_size=None, tm=None, tn=512):
    M, E = x.shape
    _, Vw = w.shape
    if vocab_size is None:
        vocab_size = Vw
    # Pad the vocab dim so the weight stream stays tiled / lane-dense
    # (e.g. 50257 -> 50304); slice the logits afterwards.
    V_pad = _round_up(Vw, 128)
    if V_pad != Vw:
        w = jnp.pad(w, ((0, 0), (0, V_pad - Vw)))
    if tm is None:
        tm = 1024 if _BIG_VMEM else 512    # fewer passes over the E x V weight
    tm = _tile_sub(M, tm)
    tn = _tile_last(V_pad, tn)
    grid = (M // tm, V_pad // tn)

    out = pl.pallas_call(
        _ln_lm_head_kernel,
        grid=grid,
        in_specs=[
            pl.BlockSpec((tm, E), lambda i, j: (i, 0)),
            pl.BlockSpec((1, E), lambda i, j: (0, 0)),
            pl.BlockSpec((1, E), lambda i, j: (0, 0)),
            pl.BlockSpec((E, tn), lambda i, j: (0, j)),
        ],
        out_specs=pl.BlockSpec((tm, tn), lambda i, j: (i, j)),
        out_shape=jax.ShapeDtypeStruct((M, V_pad), jnp.float32),
        scratch_shapes=[pltpu.VMEM((tm, E), jnp.bfloat16)],   # cached LN rows
        compiler_params=pltpu.CompilerParams(
            dimension_semantics=("parallel", "arbitrary"),
            vmem_limit_bytes=VMEM_LIMIT,
        ),
    )(x, gamma.reshape(1, E), beta.reshape(1, E), w)
    return out[:, :vocab_size]


# ----------------------------------------------------------------------------
# Parameters + forward (glue in plain JAX; hot paths are the Pallas kernels).
# Dropout layers are identity (eval / deterministic); the Prefetcher is a no-op.
# ----------------------------------------------------------------------------
def init_params(key, *, embed_dim, num_heads, num_layers, num_positions, vocab_size):
    std = 0.02
    E = embed_dim
    keys = jax.random.split(key, 3 + num_layers)

    def bf16_w(k, shape):
        # matmul weights stored bf16 (MXU-native); accumulation stays f32 in-kernel
        return (jax.random.normal(k, shape, jnp.float32) * std).astype(jnp.bfloat16)

    params = {
        "tok_emb": jax.random.normal(keys[0], (vocab_size, E), jnp.float32) * std,
        "pos_emb": jax.random.normal(keys[1], (num_positions, E), jnp.float32) * std,
        "ln_f_g": jnp.ones((E,), jnp.float32),
        "ln_f_b": jnp.zeros((E,), jnp.float32),
        "lm_head_w": bf16_w(keys[2], (E, vocab_size)),
        "layers": [],
    }
    for li in range(num_layers):
        kq, kk, kv, kp, k1, k2 = jax.random.split(keys[3 + li], 6)
        params["layers"].append({
            "ln_g": jnp.ones((E,), jnp.float32),
            "ln_b": jnp.zeros((E,), jnp.float32),
            "fc1_w": bf16_w(k1, (E, 4 * E)),
            "fc1_b": jnp.zeros((4 * E,), jnp.float32),
            "fc2_w": bf16_w(k2, (4 * E, E)),
            "fc2_b": jnp.zeros((E,), jnp.float32),
            # c_attn Conv1D(E -> 3E) pre-split into q/k/v projections (once, at init)
            "wq": bf16_w(kq, (E, E)), "bq": jnp.zeros((E,), jnp.float32),
            "wk": bf16_w(kk, (E, E)), "bk": jnp.zeros((E,), jnp.float32),
            "wv": bf16_w(kv, (E, E)), "bv": jnp.zeros((E,), jnp.float32),
            "c_proj_w": bf16_w(kp, (E, E)),
            "c_proj_b": jnp.zeros((E,), jnp.float32),
        })
    return params


def block_forward(h, layer, num_heads):
    B, S, E = h.shape
    M = B * S
    x2d = h.reshape(M, E)                                      # f32 residual stream

    # MLP branch: fused LayerNorm -> fc1 -> GELU -> fc2
    mlp = pallas_ln_mlp(x2d, layer["ln_g"], layer["ln_b"],
                        layer["fc1_w"], layer["fc1_b"],
                        layer["fc2_w"], layer["fc2_b"])        # (M, E) f32

    # Attention branch: one fused qkv projection (x read once, cast in-kernel)
    q, k, v = pallas_qkv_proj(x2d, layer["wq"], layer["wk"], layer["wv"],
                              layer["bq"], layer["bk"], layer["bv"])
    a = pallas_attention(q.reshape(B, S, E), k.reshape(B, S, E),
                         v.reshape(B, S, E), num_heads=num_heads)  # (B,S,E) bf16

    # c_proj with the "mlp + attn" add fused into its epilogue.
    # NOTE: matches the reference Block (out = ln_mlp(x) + attn(x), no extra x).
    out = pallas_matmul_bias(a.reshape(M, E), layer["c_proj_w"], layer["c_proj_b"],
                             residual=mlp, out_dtype=jnp.float32)
    return out.reshape(B, S, E)


def gpt2_lm_forward(params, tokens, *, num_heads):
    B, S = tokens.shape
    # TODO(synk): embedding gather + CUDA-stream Prefetcher have no Pallas win
    # here; gather stays in XLA, prefetcher is a no-op, dropout is identity.
    h = jnp.take(params["tok_emb"], tokens.astype(jnp.int32), axis=0)   # (B, S, E)
    pos = jnp.arange(S, dtype=jnp.int32)
    h = h + jnp.take(params["pos_emb"], pos, axis=0)[None, :, :]
    for layer in params["layers"]:
        h = block_forward(h, layer, num_heads)
    E = h.shape[-1]
    V = params["tok_emb"].shape[0]
    logits = pallas_ln_lm_head(h.reshape(B * S, E), params["ln_f_g"],
                               params["ln_f_b"], params["lm_head_w"],
                               vocab_size=V)
    return logits.reshape(B, S, V)


if __name__ == "__main__":
    # small, forward-consistent shapes
    EMBED, HEADS, LAYERS, POSITIONS, VOCAB = 32, 4, 2, 16, 128
    B, S = 2, 8

    key = jax.random.PRNGKey(0)
    pkey, dkey = jax.random.split(key)
    params = init_params(pkey, embed_dim=EMBED, num_heads=HEADS, num_layers=LAYERS,
                         num_positions=POSITIONS, vocab_size=VOCAB)
    tokens = jax.random.randint(dkey, (B, S), 0, VOCAB, dtype=jnp.int32)

    fwd = jax.jit(functools.partial(gpt2_lm_forward, num_heads=HEADS))
    logits = fwd(params, tokens)
    jax.block_until_ready(logits)
    assert logits.shape == (B, S, VOCAB)
    assert bool(jnp.all(jnp.isfinite(logits)))
    print("KERNEL_OK")
</pallas_src>

<mosaic_0001>
module attributes {stable_mosaic.version = 11 : i64} {
  func.func @_qkv_kernel(%arg0: i32, %arg1: i32, %arg2: memref<16x32xf32, #tpu.memory_space<vmem>>, %arg3: memref<32x32xbf16, #tpu.memory_space<vmem>>, %arg4: memref<32x32xbf16, #tpu.memory_space<vmem>>, %arg5: memref<32x32xbf16, #tpu.memory_space<vmem>>, %arg6: memref<1x32xf32, #tpu.memory_space<vmem>>, %arg7: memref<1x32xf32, #tpu.memory_space<vmem>>, %arg8: memref<1x32xf32, #tpu.memory_space<vmem>>, %arg9: memref<16x32xbf16, #tpu.memory_space<vmem>>, %arg10: memref<16x32xbf16, #tpu.memory_space<vmem>>, %arg11: memref<16x32xbf16, #tpu.memory_space<vmem>>) attributes {dimension_semantics = [#tpu.dimension_semantics<parallel>, #tpu.dimension_semantics<parallel>], iteration_bounds = array<i64: 1, 1>, scalar_prefetch = 0 : i64, scratch_operands = 0 : i64, tpu.core_type = #tpu.core_type<tc>, window_params = [{transform_indices = @transform_0, window_bounds = array<i64: 16, 32>}, {transform_indices = @transform_1, window_bounds = array<i64: 32, 32>}, {transform_indices = @transform_2, window_bounds = array<i64: 32, 32>}, {transform_indices = @transform_3, window_bounds = array<i64: 32, 32>}, {transform_indices = @transform_4, window_bounds = array<i64: 1, 32>}, {transform_indices = @transform_5, window_bounds = array<i64: 1, 32>}, {transform_indices = @transform_6, window_bounds = array<i64: 1, 32>}, {transform_indices = @transform_7, window_bounds = array<i64: 16, 32>}, {transform_indices = @transform_8, window_bounds = array<i64: 16, 32>}, {transform_indices = @transform_9, window_bounds = array<i64: 16, 32>}]} {
    %c0 = arith.constant 0 : index
    %c0_0 = arith.constant 0 : index
    %0 = vector.load %arg2[%c0, %c0_0] : memref<16x32xf32, #tpu.memory_space<vmem>>, vector<16x32xf32>
    %1 = arith.truncf %0 : vector<16x32xf32> to vector<16x32xbf16>
    %c0_1 = arith.constant 0 : index
    %c0_2 = arith.constant 0 : index
    %2 = vector.load %arg3[%c0_1, %c0_2] : memref<32x32xbf16, #tpu.memory_space<vmem>>, vector<32x32xbf16>
    %cst = arith.constant dense<0.000000e+00> : vector<16x32xf32>
    %3 = tpu.matmul %1, %2, %cst {dimension_numbers = #tpu.dot_dimension_numbers<[1], [0], [0], [1], [0, 0, 1, 1], [], []>} : vector<16x32xbf16>, vector<32x32xbf16>, vector<16x32xf32> -> vector<16x32xf32>
    %c0_3 = arith.constant 0 : index
    %c0_4 = arith.constant 0 : index
    %4 = vector.load %arg6[%c0_3, %c0_4] : memref<1x32xf32, #tpu.memory_space<vmem>>, vector<1x32xf32>
    %5 = vector.broadcast %4 : vector<1x32xf32> to vector<16x32xf32>
    %6 = arith.addf %3, %5 : vector<16x32xf32>
    %7 = arith.truncf %6 : vector<16x32xf32> to vector<16x32xbf16>
    %c0_5 = arith.constant 0 : index
    %c0_6 = arith.constant 0 : index
    %8 = vector.load %arg9[%c0_5, %c0_6] : memref<16x32xbf16, #tpu.memory_space<vmem>>, vector<16x32xbf16>
    tpu.vector_store %arg9[%c0_5, %c0_6], %7 {strides = array<i32>} : memref<16x32xbf16, #tpu.memory_space<vmem>>, vector<16x32xbf16>,
    %c0_7 = arith.constant 0 : index
    %c0_8 = arith.constant 0 : index
    %9 = vector.load %arg4[%c0_7, %c0_8] : memref<32x32xbf16, #tpu.memory_space<vmem>>, vector<32x32xbf16>
    %cst_9 = arith.constant dense<0.000000e+00> : vector<16x32xf32>
    %10 = tpu.matmul %1, %9, %cst_9 {dimension_numbers = #tpu.dot_dimension_numbers<[1], [0], [0], [1], [0, 0, 1, 1], [], []>} : vector<16x32xbf16>, vector<32x32xbf16>, vector<16x32xf32> -> vector<16x32xf32>
    %c0_10 = arith.constant 0 : index
    %c0_11 = arith.constant 0 : index
    %11 = vector.load %arg7[%c0_10, %c0_11] : memref<1x32xf32, #tpu.memory_space<vmem>>, vector<1x32xf32>
    %12 = vector.broadcast %11 : vector<1x32xf32> to vector<16x32xf32>
    %13 = arith.addf %10, %12 : vector<16x32xf32>
    %14 = arith.truncf %13 : vector<16x32xf32> to vector<16x32xbf16>
    %c0_12 = arith.constant 0 : index
    %c0_13 = arith.constant 0 : index
    %15 = vector.load %arg10[%c0_12, %c0_13] : memref<16x32xbf16, #tpu.memory_space<vmem>>, vector<16x32xbf16>
    tpu.vector_store %arg10[%c0_12, %c0_13], %14 {strides = array<i32>} : memref<16x32xbf16, #tpu.memory_space<vmem>>, vector<16x32xbf16>,
    %c0_14 = arith.constant 0 : index
    %c0_15 = arith.constant 0 : index
    %16 = vector.load %arg5[%c0_14, %c0_15] : memref<32x32xbf16, #tpu.memory_space<vmem>>, vector<32x32xbf16>
    %cst_16 = arith.constant dense<0.000000e+00> : vector<16x32xf32>
    %17 = tpu.matmul %1, %16, %cst_16 {dimension_numbers = #tpu.dot_dimension_numbers<[1], [0], [0], [1], [0, 0, 1, 1], [], []>} : vector<16x32xbf16>, vector<32x32xbf16>, vector<16x32xf32> -> vector<16x32xf32>
    %c0_17 = arith.constant 0 : index
    %c0_18 = arith.constant 0 : index
    %18 = vector.load %arg8[%c0_17, %c0_18] : memref<1x32xf32, #tpu.memory_space<vmem>>, vector<1x32xf32>
    %19 = vector.broadcast %18 : vector<1x32xf32> to vector<16x32xf32>
    %20 = arith.addf %17, %19 : vector<16x32xf32>
    %21 = arith.truncf %20 : vector<16x32xf32> to vector<16x32xbf16>
    %c0_19 = arith.constant 0 : index
    %c0_20 = arith.constant 0 : index
    %22 = vector.load %arg11[%c0_19, %c0_20] : memref<16x32xbf16, #tpu.memory_space<vmem>>, vector<16x32xbf16>
    tpu.vector_store %arg11[%c0_19, %c0_20], %21 {strides = array<i32>} : memref<16x32xbf16, #tpu.memory_space<vmem>>, vector<16x32xbf16>,
    return
  }
  func.func @transform_0(%arg0: i32, %arg1: i32) -> (i32, i32) {
    %c0_i32 = arith.constant 0 : i32
    %c0_i32_0 = arith.constant 0 : i32
    return %arg0, %c0_i32 : i32, i32
  }
  func.func @transform_1(%arg0: i32, %arg1: i32) -> (i32, i32) {
    %c0_i32 = arith.constant 0 : i32
    %c0_i32_0 = arith.constant 0 : i32
    return %c0_i32, %arg1 : i32, i32
  }
  func.func @transform_2(%arg0: i32, %arg1: i32) -> (i32, i32) {
    %c0_i32 = arith.constant 0 : i32
    %c0_i32_0 = arith.constant 0 : i32
    return %c0_i32, %arg1 : i32, i32
  }
  func.func @transform_3(%arg0: i32, %arg1: i32) -> (i32, i32) {
    %c0_i32 = arith.constant 0 : i32
    %c0_i32_0 = arith.constant 0 : i32
    return %c0_i32, %arg1 : i32, i32
  }
  func.func @transform_4(%arg0: i32, %arg1: i32) -> (i32, i32) {
    %c0_i32 = arith.constant 0 : i32
    %c0_i32_0 = arith.constant 0 : i32
    return %c0_i32, %arg1 : i32, i32
  }
  func.func @transform_5(%arg0: i32, %arg1: i32) -> (i32, i32) {
    %c0_i32 = arith.constant 0 : i32
    %c0_i32_0 = arith.constant 0 : i32
    return %c0_i32, %arg1 : i32, i32
  }
  func.func @transform_6(%arg0: i32, %arg1: i32) -> (i32, i32) {
    %c0_i32 = arith.constant 0 : i32
    %c0_i32_0 = arith.constant 0 : i32
    return %c0_i32, %arg1 : i32, i32
  }
  func.func @transform_7(%arg0: i32, %arg1: i32) -> (i32, i32) {
    %c0_i32 = arith.constant 0 : i32
    return %arg0, %arg1 : i32, i32
  }
  func.func @transform_8(%arg0: i32, %arg1: i32) -> (i32, i32) {
    %c0_i32 = arith.constant 0 : i32
    return %arg0, %arg1 : i32, i32
  }
  func.func @transform_9(%arg0: i32, %arg1: i32) -> (i32, i32) {
    %c0_i32 = arith.constant 0 : i32
    return %arg0, %arg1 : i32, i32
  }
}

module attributes {stable_mosaic.version = 11 : i64} {
  func.func @_attention_kernel(%arg0: i32, %arg1: i32, %arg2: memref<1x8x32xbf16, #tpu.memory_space<vmem>>, %arg3: memref<1x8x32xbf16, #tpu.memory_space<vmem>>, %arg4: memref<1x8x32xbf16, #tpu.memory_space<vmem>>, %arg5: memref<1x8x32xbf16, #tpu.memory_space<vmem>>, %arg6: memref<8x32xf32, #tpu.memory_space<vmem>>) attributes {dimension_semantics = [#tpu.dimension_semantics<parallel>, #tpu.dimension_semantics<parallel>], iteration_bounds = array<i64: 2, 1>, scalar_prefetch = 0 : i64, scratch_operands = 1 : i64, tpu.core_type = #tpu.core_type<tc>, window_params = [{transform_indices = @transform_0, window_bounds = array<i64: 1, 8, 32>}, {transform_indices = @transform_1, window_bounds = array<i64: 1, 8, 32>}, {transform_indices = @transform_2, window_bounds = array<i64: 1, 8, 32>}, {transform_indices = @transform_3, window_bounds = array<i64: 1, 8, 32>}]} {
    %c0 = arith.constant 0 : index
    %c0_0 = arith.constant 0 : index
    %c0_1 = arith.constant 0 : index
    %0 = vector.load %arg2[%c0, %c0_0, %c0_1] : memref<1x8x32xbf16, #tpu.memory_space<vmem>>, vector<1x8x32xbf16>
    %1 = vector.shape_cast %0 : vector<1x8x32xbf16> to vector<8x32xbf16>
    %2 = arith.extf %1 : vector<8x32xbf16> to vector<8x32xf32>
    %cst = arith.constant 0.353553385 : f32
    %3 = vector.broadcast %cst : f32 to vector<8x32xf32>
    %4 = arith.mulf %2, %3 : vector<8x32xf32>
    %5 = arith.truncf %4 : vector<8x32xf32> to vector<8x32xbf16>
    %c0_2 = arith.constant 0 : index
    %c0_3 = arith.constant 0 : index
    %c0_4 = arith.constant 0 : index
    %6 = vector.load %arg3[%c0_2, %c0_3, %c0_4] : memref<1x8x32xbf16, #tpu.memory_space<vmem>>, vector<1x8x32xbf16>
    %7 = vector.shape_cast %6 : vector<1x8x32xbf16> to vector<8x32xbf16>
    %c0_5 = arith.constant 0 : index
    %c0_6 = arith.constant 0 : index
    %c0_7 = arith.constant 0 : index
    %8 = vector.load %arg4[%c0_5, %c0_6, %c0_7] : memref<1x8x32xbf16, #tpu.memory_space<vmem>>, vector<1x8x32xbf16>
    %9 = vector.shape_cast %8 : vector<1x8x32xbf16> to vector<8x32xbf16>
    %c8_i32 = arith.constant 8 : i32
    %10 = arith.muli %arg1, %c8_i32 : i32
    %11 = tpu.iota {dimensions = array<i32: 0>} : vector<8x8xi32>
    %12 = vector.broadcast %10 : i32 to vector<8x8xi32>
    %13 = arith.addi %12, %11 : vector<8x8xi32>
    %14 = tpu.iota {dimensions = array<i32: 1>} : vector<8x8xi32>
    %15 = arith.cmpi sle, %14, %13 : vector<8x8xi32>
    %16 = vector.extract_strided_slice %5 {offsets = [0, 0], sizes = [8, 8], strides = [1, 1]} : vector<8x32xbf16> to vector<8x8xbf16>
    %17 = vector.extract_strided_slice %7 {offsets = [0, 0], sizes = [8, 8], strides = [1, 1]} : vector<8x32xbf16> to vector<8x8xbf16>
    %18 = vector.extract_strided_slice %9 {offsets = [0, 0], sizes = [8, 8], strides = [1, 1]} : vector<8x32xbf16> to vector<8x8xbf16>
    %cst_8 = arith.constant dense<0.000000e+00> : vector<8x8xf32>
    %19 = tpu.matmul %16, %17, %cst_8 {dimension_numbers = #tpu.dot_dimension_numbers<[1], [1], [0], [0], [0, 0, 1, 0], [], []>} : vector<8x8xbf16>, vector<8x8xbf16>, vector<8x8xf32> -> vector<8x8xf32>
    %cst_9 = arith.constant -1.000000e+04 : f32
    %20 = vector.broadcast %cst_9 : f32 to vector<8x8xf32>
    %21 = arith.select %15, %19, %20 : vector<8x8xi1>, vector<8x8xf32>
    %cst_10 = arith.constant dense<0xFF800000> : vector<8xf32>
    %22 = vector.multi_reduction <maximumf>, %21, %cst_10 [1] : vector<8x8xf32> to vector<8xf32>
    %23 = vector.shape_cast %22 : vector<8xf32> to vector<8x1xf32>
    %24 = vector.broadcast %23 : vector<8x1xf32> to vector<8x8xf32>
    %25 = arith.subf %21, %24 : vector<8x8xf32>
    %26 = math.exp %25 : vector<8x8xf32>
    %cst_11 = arith.constant dense<0.000000e+00> : vector<8xf32>
    %27 = vector.multi_reduction <add>, %26, %cst_11 [1] : vector<8x8xf32> to vector<8xf32>
    %28 = vector.shape_cast %27 : vector<8xf32> to vector<8x1xf32>
    %29 = vector.broadcast %28 : vector<8x1xf32> to vector<8x8xf32>
    %30 = arith.divf %26, %29 : vector<8x8xf32>
    %31 = arith.truncf %30 : vector<8x8xf32> to vector<8x8xbf16>
    %cst_12 = arith.constant dense<0.000000e+00> : vector<8x8xf32>
    %32 = tpu.matmul %31, %18, %cst_12 {dimension_numbers = #tpu.dot_dimension_numbers<[1], [0], [0], [1], [0, 0, 1, 1], [], []>} : vector<8x8xbf16>, vector<8x8xbf16>, vector<8x8xf32> -> vector<8x8xf32>
    %c0_13 = arith.constant 0 : index
    %c0_14 = arith.constant 0 : index
    %33 = vector.load %arg6[%c0_13, %c0_14] : memref<8x32xf32, #tpu.memory_space<vmem>>, vector<8x8xf32>
    tpu.vector_store %arg6[%c0_13, %c0_14], %32 {strides = array<i32>} : memref<8x32xf32, #tpu.memory_space<vmem>>, vector<8x8xf32>,
    %34 = vector.extract_strided_slice %5 {offsets = [0, 8], sizes = [8, 8], strides = [1, 1]} : vector<8x32xbf16> to vector<8x8xbf16>
    %35 = vector.extract_strided_slice %7 {offsets = [0, 8], sizes = [8, 8], strides = [1, 1]} : vector<8x32xbf16> to vector<8x8xbf16>
    %36 = vector.extract_strided_slice %9 {offsets = [0, 8], sizes = [8, 8], strides = [1, 1]} : vector<8x32xbf16> to vector<8x8xbf16>
    %cst_15 = arith.constant dense<0.000000e+00> : vector<8x8xf32>
    %37 = tpu.matmul %34, %35, %cst_15 {dimension_numbers = #tpu.dot_dimension_numbers<[1], [1], [0], [0], [0, 0, 1, 0], [], []>} : vector<8x8xbf16>, vector<8x8xbf16>, vector<8x8xf32> -> vector<8x8xf32>
    %cst_16 = arith.constant -1.000000e+04 : f32
    %38 = vector.broadcast %cst_16 : f32 to vector<8x8xf32>
    %39 = arith.select %15, %37, %38 : vector<8x8xi1>, vector<8x8xf32>
    %cst_17 = arith.constant dense<0xFF800000> : vector<8xf32>
    %40 = vector.multi_reduction <maximumf>, %39, %cst_17 [1] : vector<8x8xf32> to vector<8xf32>
    %41 = vector.shape_cast %40 : vector<8xf32> to vector<8x1xf32>
    %42 = vector.broadcast %41 : vector<8x1xf32> to vector<8x8xf32>
    %43 = arith.subf %39, %42 : vector<8x8xf32>
    %44 = math.exp %43 : vector<8x8xf32>
    %cst_18 = arith.constant dense<0.000000e+00> : vector<8xf32>
    %45 = vector.multi_reduction <add>, %44, %cst_18 [1] : vector<8x8xf32> to vector<8xf32>
    %46 = vector.shape_cast %45 : vector<8xf32> to vector<8x1xf32>
    %47 = vector.broadcast %46 : vector<8x1xf32> to vector<8x8xf32>
    %48 = arith.divf %44, %47 : vector<8x8xf32>
    %49 = arith.truncf %48 : vector<8x8xf32> to vector<8x8xbf16>
    %cst_19 = arith.constant dense<0.000000e+00> : vector<8x8xf32>
    %50 = tpu.matmul %49, %36, %cst_19 {dimension_numbers = #tpu.dot_dimension_numbers<[1], [0], [0], [1], [0, 0, 1, 1], [], []>} : vector<8x8xbf16>, vector<8x8xbf16>, vector<8x8xf32> -> vector<8x8xf32>
    %c0_20 = arith.constant 0 : index
    %c8 = arith.constant 8 : index
    %51 = vector.load %arg6[%c0_20, %c8] : memref<8x32xf32, #tpu.memory_space<vmem>>, vector<8x8xf32>
    tpu.vector_store %arg6[%c0_20, %c8], %50 {strides = array<i32>} : memref<8x32xf32, #tpu.memory_space<vmem>>, vector<8x8xf32>,
    %52 = vector.extract_strided_slice %5 {offsets = [0, 16], sizes = [8, 8], strides = [1, 1]} : vector<8x32xbf16> to vector<8x8xbf16>
    %53 = vector.extract_strided_slice %7 {offsets = [0, 16], sizes = [8, 8], strides = [1, 1]} : vector<8x32xbf16> to vector<8x8xbf16>
    %54 = vector.extract_strided_slice %9 {offsets = [0, 16], sizes = [8, 8], strides = [1, 1]} : vector<8x32xbf16> to vector<8x8xbf16>
    %cst_21 = arith.constant dense<0.000000e+00> : vector<8x8xf32>
    %55 = tpu.matmul %52, %53, %cst_21 {dimension_numbers = #tpu.dot_dimension_numbers<[1], [1], [0], [0], [0, 0, 1, 0], [], []>} : vector<8x8xbf16>, vector<8x8xbf16>, vector<8x8xf32> -> vector<8x8xf32>
    %cst_22 = arith.constant -1.000000e+04 : f32
    %56 = vector.broadcast %cst_22 : f32 to vector<8x8xf32>
    %57 = arith.select %15, %55, %56 : vector<8x8xi1>, vector<8x8xf32>
    %cst_23 = arith.constant dense<0xFF800000> : vector<8xf32>
    %58 = vector.multi_reduction <maximumf>, %57, %cst_23 [1] : vector<8x8xf32> to vector<8xf32>
    %59 = vector.shape_cast %58 : vector<8xf32> to vector<8x1xf32>
    %60 = vector.broadcast %59 : vector<8x1xf32> to vector<8x8xf32>
    %61 = arith.subf %57, %60 : vector<8x8xf32>
    %62 = math.exp %61 : vector<8x8xf32>
    %cst_24 = arith.constant dense<0.000000e+00> : vector<8xf32>
    %63 = vector.multi_reduction <add>, %62, %cst_24 [1] : vector<8x8xf32> to vector<8xf32>
    %64 = vector.shape_cast %63 : vector<8xf32> to vector<8x1xf32>
    %65 = vector.broadcast %64 : vector<8x1xf32> to vector<8x8xf32>
    %66 = arith.divf %62, %65 : vector<8x8xf32>
    %67 = arith.truncf %66 : vector<8x8xf32> to vector<8x8xbf16>
    %cst_25 = arith.constant dense<0.000000e+00> : vector<8x8xf32>
    %68 = tpu.matmul %67, %54, %cst_25 {dimension_numbers = #tpu.dot_dimension_numbers<[1], [0], [0], [1], [0, 0, 1, 1], [], []>} : vector<8x8xbf16>, vector<8x8xbf16>, vector<8x8xf32> -> vector<8x8xf32>
    %c0_26 = arith.constant 0 : index
    %c16 = arith.constant 16 : index
    %69 = vector.load %arg6[%c0_26, %c16] : memref<8x32xf32, #tpu.memory_space<vmem>>, vector<8x8xf32>
    tpu.vector_store %arg6[%c0_26, %c16], %68 {strides = array<i32>} : memref<8x32xf32, #tpu.memory_space<vmem>>, vector<8x8xf32>,
    %70 = vector.extract_strided_slice %5 {offsets = [0, 24], sizes = [8, 8], strides = [1, 1]} : vector<8x32xbf16> to vector<8x8xbf16>
    %71 = vector.extract_strided_slice %7 {offsets = [0, 24], sizes = [8, 8], strides = [1, 1]} : vector<8x32xbf16> to vector<8x8xbf16>
    %72 = vector.extract_strided_slice %9 {offsets = [0, 24], sizes = [8, 8], strides = [1, 1]} : vector<8x32xbf16> to vector<8x8xbf16>
    %cst_27 = arith.constant dense<0.000000e+00> : vector<8x8xf32>
    %73 = tpu.matmul %70, %71, %cst_27 {dimension_numbers = #tpu.dot_dimension_numbers<[1], [1], [0], [0], [0, 0, 1, 0], [], []>} : vector<8x8xbf16>, vector<8x8xbf16>, vector<8x8xf32> -> vector<8x8xf32>
    %cst_28 = arith.constant -1.000000e+04 : f32
    %74 = vector.broadcast %cst_28 : f32 to vector<8x8xf32>
    %75 = arith.select %15, %73, %74 : vector<8x8xi1>, vector<8x8xf32>
    %cst_29 = arith.constant dense<0xFF800000> : vector<8xf32>
    %76 = vector.multi_reduction <maximumf>, %75, %cst_29 [1] : vector<8x8xf32> to vector<8xf32>
    %77 = vector.shape_cast %76 : vector<8xf32> to vector<8x1xf32>
    %78 = vector.broadcast %77 : vector<8x1xf32> to vector<8x8xf32>
    %79 = arith.subf %75, %78 : vector<8x8xf32>
    %80 = math.exp %79 : vector<8x8xf32>
    %cst_30 = arith.constant dense<0.000000e+00> : vector<8xf32>
    %81 = vector.multi_reduction <add>, %80, %cst_30 [1] : vector<8x8xf32> to vector<8xf32>
    %82 = vector.shape_cast %81 : vector<8xf32> to vector<8x1xf32>
    %83 = vector.broadcast %82 : vector<8x1xf32> to vector<8x8xf32>
    %84 = arith.divf %80, %83 : vector<8x8xf32>
    %85 = arith.truncf %84 : vector<8x8xf32> to vector<8x8xbf16>
    %cst_31 = arith.constant dense<0.000000e+00> : vector<8x8xf32>
    %86 = tpu.matmul %85, %72, %cst_31 {dimension_numbers = #tpu.dot_dimension_numbers<[1], [0], [0], [1], [0, 0, 1, 1], [], []>} : vector<8x8xbf16>, vector<8x8xbf16>, vector<8x8xf32> -> vector<8x8xf32>
    %c0_32 = arith.constant 0 : index
    %c24 = arith.constant 24 : index
    %87 = vector.load %arg6[%c0_32, %c24] : memref<8x32xf32, #tpu.memory_space<vmem>>, vector<8x8xf32>
    tpu.vector_store %arg6[%c0_32, %c24], %86 {strides = array<i32>} : memref<8x32xf32, #tpu.memory_space<vmem>>, vector<8x8xf32>,
    %c0_33 = arith.constant 0 : index
    %c0_34 = arith.constant 0 : index
    %88 = vector.load %arg6[%c0_33, %c0_34] : memref<8x32xf32, #tpu.memory_space<vmem>>, vector<8x32xf32>
    %89 = arith.truncf %88 : vector<8x32xf32> to vector<8x32xbf16>
    %c0_35 = arith.constant 0 : index
    %c0_36 = arith.constant 0 : index
    %c0_37 = arith.constant 0 : index
    %90 = vector.load %arg5[%c0_35, %c0_36, %c0_37] : memref<1x8x32xbf16, #tpu.memory_space<vmem>>, vector<1x8x32xbf16>
    %91 = vector.shape_cast %90 : vector<1x8x32xbf16> to vector<8x32xbf16>
    %92 = vector.shape_cast %89 : vector<8x32xbf16> to vector<1x8x32xbf16>
    tpu.vector_store %arg5[%c0_35, %c0_36, %c0_37], %92 {strides = array<i32>} : memref<1x8x32xbf16, #tpu.memory_space<vmem>>, vector<1x8x32xbf16>,
    return
  }
  func.func @transform_0(%arg0: i32, %arg1: i32) -> (i32, i32, i32) {
    %c0_i32 = arith.constant 0 : i32
    %c0_i32_0 = arith.constant 0 : i32
    return %arg0, %arg1, %c0_i32 : i32, i32, i32
  }
  func.func @transform_1(%arg0: i32, %arg1: i32) -> (i32, i32, i32) {
    %c0_i32 = arith.constant 0 : i32
    %c0_i32_0 = arith.constant 0 : i32
    %c0_i32_1 = arith.constant 0 : i32
    return %arg0, %c0_i32, %c0_i32_0 : i32, i32, i32
  }
  func.func @transform_2(%arg0: i32, %arg1: i32) -> (i32, i32, i32) {
    %c0_i32 = arith.constant 0 : i32
    %c0_i32_0 = arith.constant 0 : i32
    %c0_i32_1 = arith.constant 0 : i32
    return %arg0, %c0_i32, %c0_i32_0 : i32, i32, i32
  }
  func.func @transform_3(%arg0: i32, %arg1: i32) -> (i32, i32, i32) {
    %c0_i32 = arith.constant 0 : i32
    %c0_i32_0 = arith.constant 0 : i32
    return %arg0, %arg1, %c0_i32 : i32, i32, i32
  }
}

module attributes {stable_mosaic.version = 11 : i64} {
  func.func @_matmul_bias_res_kernel(%arg0: i32, %arg1: i32, %arg2: memref<16x32xbf16, #tpu.memory_space<vmem>>, %arg3: memref<32x32xbf16, #tpu.memory_space<vmem>>, %arg4: memref<1x32xf32, #tpu.memory_space<vmem>>, %arg5: memref<16x32xf32, #tpu.memory_space<vmem>>, %arg6: memref<16x32xf32, #tpu.memory_space<vmem>>) attributes {dimension_semantics = [#tpu.dimension_semantics<parallel>, #tpu.dimension_semantics<parallel>], iteration_bounds = array<i64: 1, 1>, scalar_prefetch = 0 : i64, scratch_operands = 0 : i64, tpu.core_type = #tpu.core_type<tc>, window_params = [{transform_indices = @transform_0, window_bounds = array<i64: 16, 32>}, {transform_indices = @transform_1, window_bounds = array<i64: 32, 32>}, {transform_indices = @transform_2, window_bounds = array<i64: 1, 32>}, {transform_indices = @transform_3, window_bounds = array<i64: 16, 32>}, {transform_indices = @transform_4, window_bounds = array<i64: 16, 32>}]} {
    %c0 = arith.constant 0 : index
    %c0_0 = arith.constant 0 : index
    %0 = vector.load %arg2[%c0, %c0_0] : memref<16x32xbf16, #tpu.memory_space<vmem>>, vector<16x32xbf16>
    %c0_1 = arith.constant 0 : index
    %c0_2 = arith.constant 0 : index
    %1 = vector.load %arg3[%c0_1, %c0_2] : memref<32x32xbf16, #tpu.memory_space<vmem>>, vector<32x32xbf16>
    %cst = arith.constant dense<0.000000e+00> : vector<16x32xf32>
    %2 = tpu.matmul %0, %1, %cst {dimension_numbers = #tpu.dot_dimension_numbers<[1], [0], [0], [1], [0, 0, 1, 1], [], []>} : vector<16x32xbf16>, vector<32x32xbf16>, vector<16x32xf32> -> vector<16x32xf32>
    %c0_3 = arith.constant 0 : index
    %c0_4 = arith.constant 0 : index
    %3 = vector.load %arg4[%c0_3, %c0_4] : memref<1x32xf32, #tpu.memory_space<vmem>>, vector<1x32xf32>
    %4 = vector.broadcast %3 : vector<1x32xf32> to vector<16x32xf32>
    %5 = arith.addf %2, %4 : vector<16x32xf32>
    %c0_5 = arith.constant 0 : index
    %c0_6 = arith.constant 0 : index
    %6 = vector.load %arg5[%c0_5, %c0_6] : memref<16x32xf32, #tpu.memory_space<vmem>>, vector<16x32xf32>
    %7 = arith.addf %5, %6 : vector<16x32xf32>
    %c0_7 = arith.constant 0 : index
    %c0_8 = arith.constant 0 : index
    %8 = vector.load %arg6[%c0_7, %c0_8] : memref<16x32xf32, #tpu.memory_space<vmem>>, vector<16x32xf32>
    tpu.vector_store %arg6[%c0_7, %c0_8], %7 {strides = array<i32>} : memref<16x32xf32, #tpu.memory_space<vmem>>, vector<16x32xf32>,
    return
  }
  func.func @transform_0(%arg0: i32, %arg1: i32) -> (i32, i32) {
    %c0_i32 = arith.constant 0 : i32
    %c0_i32_0 = arith.constant 0 : i32
    return %arg0, %c0_i32 : i32, i32
  }
  func.func @transform_1(%arg0: i32, %arg1: i32) -> (i32, i32) {
    %c0_i32 = arith.constant 0 : i32
    %c0_i32_0 = arith.constant 0 : i32
    return %c0_i32, %arg1 : i32, i32
  }
  func.func @transform_2(%arg0: i32, %arg1: i32) -> (i32, i32) {
    %c0_i32 = arith.constant 0 : i32
    %c0_i32_0 = arith.constant 0 : i32
    return %c0_i32, %arg1 : i32, i32
  }
  func.func @transform_3(%arg0: i32, %arg1: i32) -> (i32, i32) {
    %c0_i32 = arith.constant 0 : i32
    return %arg0, %arg1 : i32, i32
  }
  func.func @transform_4(%arg0: i32, %arg1: i32) -> (i32, i32) {
    %c0_i32 = arith.constant 0 : i32
    return %arg0, %arg1 : i32, i32
  }
}

module attributes {stable_mosaic.version = 11 : i64} {
  func.func @_ln_mlp_kernel(%arg0: i32, %arg1: i32, %arg2: memref<16x32xf32, #tpu.memory_space<vmem>>, %arg3: memref<1x32xf32, #tpu.memory_space<vmem>>, %arg4: memref<1x32xf32, #tpu.memory_space<vmem>>, %arg5: memref<32x128xbf16, #tpu.memory_space<vmem>>, %arg6: memref<1x128xf32, #tpu.memory_space<vmem>>, %arg7: memref<128x32xbf16, #tpu.memory_space<vmem>>, %arg8: memref<1x32xf32, #tpu.memory_space<vmem>>, %arg9: memref<16x32xf32, #tpu.memory_space<vmem>>, %arg10: memref<16x32xf32, #tpu.memory_space<vmem>>, %arg11: memref<16x32xbf16, #tpu.memory_space<vmem>>) attributes {dimension_semantics = [#tpu.dimension_semantics<parallel>, #tpu.dimension_semantics<arbitrary>], iteration_bounds = array<i64: 1, 1>, scalar_prefetch = 0 : i64, scratch_operands = 2 : i64, tpu.core_type = #tpu.core_type<tc>, window_params = [{transform_indices = @transform_0, window_bounds = array<i64: 16, 32>}, {pipeline_mode = #tpu.pipeline_mode<synchronous>, transform_indices = @transform_1, window_bounds = array<i64: 1, 32>}, {pipeline_mode = #tpu.pipeline_mode<synchronous>, transform_indices = @transform_2, window_bounds = array<i64: 1, 32>}, {transform_indices = @transform_3, window_bounds = array<i64: 32, 128>}, {transform_indices = @transform_4, window_bounds = array<i64: 1, 128>}, {transform_indices = @transform_5, window_bounds = array<i64: 128, 32>}, {pipeline_mode = #tpu.pipeline_mode<synchronous>, transform_indices = @transform_6, window_bounds = array<i64: 1, 32>}, {transform_indices = @transform_7, window_bounds = array<i64: 16, 32>}]} {
    %c0_i32 = arith.constant 0 : i32
    %0 = arith.cmpi eq, %arg1, %c0_i32 : i32
    %1 = arith.extui %0 : i1 to i32
    %c0_i32_0 = arith.constant 0 : i32
    %2 = arith.cmpi ne, %1, %c0_i32_0 : i32
    scf.if %2 {
      %c0_19 = arith.constant 0 : index
      %c0_20 = arith.constant 0 : index
      %31 = vector.load %arg2[%c0_19, %c0_20] : memref<16x32xf32, #tpu.memory_space<vmem>>, vector<16x32xf32>
      %cst_21 = arith.constant dense<0.000000e+00> : vector<16xf32>
      %32 = vector.multi_reduction <add>, %31, %cst_21 [1] : vector<16x32xf32> to vector<16xf32>
      %33 = vector.shape_cast %32 : vector<16xf32> to vector<16x1xf32>
      %cst_22 = arith.constant 3.200000e+01 : f32
      %34 = vector.broadcast %cst_22 : f32 to vector<16x1xf32>
      %35 = arith.divf %33, %34 : vector<16x1xf32>
      %36 = vector.broadcast %35 : vector<16x1xf32> to vector<16x32xf32>
      %37 = arith.subf %31, %36 : vector<16x32xf32>
      %38 = arith.mulf %37, %37 : vector<16x32xf32>
      %cst_23 = arith.constant dense<0.000000e+00> : vector<16xf32>
      %39 = vector.multi_reduction <add>, %38, %cst_23 [1] : vector<16x32xf32> to vector<16xf32>
      %40 = vector.shape_cast %39 : vector<16xf32> to vector<16x1xf32>
      %cst_24 = arith.constant 3.200000e+01 : f32
      %41 = vector.broadcast %cst_24 : f32 to vector<16x1xf32>
      %42 = arith.divf %40, %41 : vector<16x1xf32>
      %43 = vector.broadcast %35 : vector<16x1xf32> to vector<16x32xf32>
      %44 = arith.subf %31, %43 : vector<16x32xf32>
      %cst_25 = arith.constant 9.99999974E-6 : f32
      %45 = vector.broadcast %cst_25 : f32 to vector<16x1xf32>
      %46 = arith.addf %42, %45 : vector<16x1xf32>
      %47 = math.rsqrt %46 : vector<16x1xf32>
      %48 = vector.broadcast %47 : vector<16x1xf32> to vector<16x32xf32>
      %49 = arith.mulf %44, %48 : vector<16x32xf32>
      %c0_26 = arith.constant 0 : index
      %c0_27 = arith.constant 0 : index
      %50 = vector.load %arg3[%c0_26, %c0_27] : memref<1x32xf32, #tpu.memory_space<vmem>>, vector<1x32xf32>
      %51 = vector.broadcast %50 : vector<1x32xf32> to vector<16x32xf32>
      %52 = arith.mulf %49, %51 : vector<16x32xf32>
      %c0_28 = arith.constant 0 : index
      %c0_29 = arith.constant 0 : index
      %53 = vector.load %arg4[%c0_28, %c0_29] : memref<1x32xf32, #tpu.memory_space<vmem>>, vector<1x32xf32>
      %54 = vector.broadcast %53 : vector<1x32xf32> to vector<16x32xf32>
      %55 = arith.addf %52, %54 : vector<16x32xf32>
      %56 = arith.truncf %55 : vector<16x32xf32> to vector<16x32xbf16>
      %c0_30 = arith.constant 0 : index
      %c0_31 = arith.constant 0 : index
      %57 = vector.load %arg11[%c0_30, %c0_31] : memref<16x32xbf16, #tpu.memory_space<vmem>>, vector<16x32xbf16>
      tpu.vector_store %arg11[%c0_30, %c0_31], %56 {strides = array<i32>} : memref<16x32xbf16, #tpu.memory_space<vmem>>, vector<16x32xbf16>,
      %cst_32 = arith.constant 0.000000e+00 : f32
      %58 = vector.broadcast %cst_32 : f32 to vector<16x32xf32>
      %c0_33 = arith.constant 0 : index
      %c0_34 = arith.constant 0 : index
      %59 = vector.load %arg10[%c0_33, %c0_34] : memref<16x32xf32, #tpu.memory_space<vmem>>, vector<16x32xf32>
      tpu.vector_store %arg10[%c0_33, %c0_34], %58 {strides = array<i32>} : memref<16x32xf32, #tpu.memory_space<vmem>>, vector<16x32xf32>,
    } else {
    }
    %c0 = arith.constant 0 : index
    %c0_1 = arith.constant 0 : index
    %3 = vector.load %arg11[%c0, %c0_1] : memref<16x32xbf16, #tpu.memory_space<vmem>>, vector<16x32xbf16>
    %c0_2 = arith.constant 0 : index
    %c0_3 = arith.constant 0 : index
    %4 = vector.load %arg5[%c0_2, %c0_3] : memref<32x128xbf16, #tpu.memory_space<vmem>>, vector<32x128xbf16>
    %cst = arith.constant dense<0.000000e+00> : vector<16x128xf32>
    %5 = tpu.matmul %3, %4, %cst {dimension_numbers = #tpu.dot_dimension_numbers<[1], [0], [0], [1], [0, 0, 1, 1], [], []>} : vector<16x32xbf16>, vector<32x128xbf16>, vector<16x128xf32> -> vector<16x128xf32>
    %c0_4 = arith.constant 0 : index
    %c0_5 = arith.constant 0 : index
    %6 = vector.load %arg6[%c0_4, %c0_5] : memref<1x128xf32, #tpu.memory_space<vmem>>, vector<1x128xf32>
    %7 = vector.broadcast %6 : vector<1x128xf32> to vector<16x128xf32>
    %8 = arith.addf %5, %7 : vector<16x128xf32>
    %cst_6 = arith.constant 5.000000e-01 : f32
    %9 = vector.broadcast %cst_6 : f32 to vector<16x128xf32>
    %10 = arith.mulf %9, %8 : vector<16x128xf32>
    %11 = arith.mulf %8, %8 : vector<16x128xf32>
    %12 = arith.mulf %8, %11 : vector<16x128xf32>
    %cst_7 = arith.constant 4.471500e-02 : f32
    %13 = vector.broadcast %cst_7 : f32 to vector<16x128xf32>
    %14 = arith.mulf %13, %12 : vector<16x128xf32>
    %15 = arith.addf %8, %14 : vector<16x128xf32>
    %cst_8 = arith.constant 0.797884583 : f32
    %16 = vector.broadcast %cst_8 : f32 to vector<16x128xf32>
    %17 = arith.mulf %16, %15 : vector<16x128xf32>
    %18 = math.tanh %17 : vector<16x128xf32>
    %cst_9 = arith.constant 1.000000e+00 : f32
    %19 = vector.broadcast %cst_9 : f32 to vector<16x128xf32>
    %20 = arith.addf %19, %18 : vector<16x128xf32>
    %21 = arith.mulf %10, %20 : vector<16x128xf32>
    %c0_10 = arith.constant 0 : index
    %c0_11 = arith.constant 0 : index
    %22 = vector.load %arg10[%c0_10, %c0_11] : memref<16x32xf32, #tpu.memory_space<vmem>>, vector<16x32xf32>
    %23 = arith.truncf %21 : vector<16x128xf32> to vector<16x128xbf16>
    %c0_12 = arith.constant 0 : index
    %c0_13 = arith.constant 0 : index
    %24 = vector.load %arg7[%c0_12, %c0_13] : memref<128x32xbf16, #tpu.memory_space<vmem>>, vector<128x32xbf16>
    %cst_14 = arith.constant dense<0.000000e+00> : vector<16x32xf32>
    %25 = tpu.matmul %23, %24, %cst_14 {dimension_numbers = #tpu.dot_dimension_numbers<[1], [0], [0], [1], [0, 0, 1, 1], [], []>} : vector<16x128xbf16>, vector<128x32xbf16>, vector<16x32xf32> -> vector<16x32xf32>
    %26 = arith.addf %22, %25 : vector<16x32xf32>
    %c0_15 = arith.constant 0 : index
    %c0_16 = arith.constant 0 : index
    %27 = vector.load %arg10[%c0_15, %c0_16] : memref<16x32xf32, #tpu.memory_space<vmem>>, vector<16x32xf32>
    tpu.vector_store %arg10[%c0_15, %c0_16], %26 {strides = array<i32>} : memref<16x32xf32, #tpu.memory_space<vmem>>, vector<16x32xf32>,
    %c0_i32_17 = arith.constant 0 : i32
    %28 = arith.cmpi eq, %arg1, %c0_i32_17 : i32
    %29 = arith.extui %28 : i1 to i32
    %c0_i32_18 = arith.constant 0 : i32
    %30 = arith.cmpi ne, %29, %c0_i32_18 : i32
    scf.if %30 {
      %c0_19 = arith.constant 0 : index
      %c0_20 = arith.constant 0 : index
      %31 = vector.load %arg10[%c0_19, %c0_20] : memref<16x32xf32, #tpu.memory_space<vmem>>, vector<16x32xf32>
      %c0_21 = arith.constant 0 : index
      %c0_22 = arith.constant 0 : index
      %32 = vector.load %arg8[%c0_21, %c0_22] : memref<1x32xf32, #tpu.memory_space<vmem>>, vector<1x32xf32>
      %33 = vector.broadcast %32 : vector<1x32xf32> to vector<16x32xf32>
      %34 = arith.addf %31, %33 : vector<16x32xf32>
      %c0_23 = arith.constant 0 : index
      %c0_24 = arith.constant 0 : index
      %35 = vector.load %arg9[%c0_23, %c0_24] : memref<16x32xf32, #tpu.memory_space<vmem>>, vector<16x32xf32>
      tpu.vector_store %arg9[%c0_23, %c0_24], %34 {strides = array<i32>} : memref<16x32xf32, #tpu.memory_space<vmem>>, vector<16x32xf32>,
    } else {
    }
    return
  }
  func.func @transform_0(%arg0: i32, %arg1: i32) -> (i32, i32) {
    %c0_i32 = arith.constant 0 : i32
    %c0_i32_0 = arith.constant 0 : i32
    return %arg0, %c0_i32 : i32, i32
  }
  func.func @transform_1(%arg0: i32, %arg1: i32) -> (i32, i32) {
    %c0_i32 = arith.constant 0 : i32
    %c0_i32_0 = arith.constant 0 : i32
    %c0_i32_1 = arith.constant 0 : i32
    return %c0_i32, %c0_i32_0 : i32, i32
  }
  func.func @transform_2(%arg0: i32, %arg1: i32) -> (i32, i32) {
    %c0_i32 = arith.constant 0 : i32
    %c0_i32_0 = arith.constant 0 : i32
    %c0_i32_1 = arith.constant 0 : i32
    return %c0_i32, %c0_i32_0 : i32, i32
  }
  func.func @transform_3(%arg0: i32, %arg1: i32) -> (i32, i32) {
    %c0_i32 = arith.constant 0 : i32
    %c0_i32_0 = arith.constant 0 : i32
    return %c0_i32, %arg1 : i32, i32
  }
  func.func @transform_4(%arg0: i32, %arg1: i32) -> (i32, i32) {
    %c0_i32 = arith.constant 0 : i32
    %c0_i32_0 = arith.constant 0 : i32
    return %c0_i32, %arg1 : i32, i32
  }
  func.func @transform_5(%arg0: i32, %arg1: i32) -> (i32, i32) {
    %c0_i32 = arith.constant 0 : i32
    %c0_i32_0 = arith.constant 0 : i32
    return %arg1, %c0_i32 : i32, i32
  }
  func.func @transform_6(%arg0: i32, %arg1: i32) -> (i32, i32) {
    %c0_i32 = arith.constant 0 : i32
    %c0_i32_0 = arith.constant 0 : i32
    %c0_i32_1 = arith.constant 0 : i32
    return %c0_i32, %c0_i32_0 : i32, i32
  }
  func.func @transform_7(%arg0: i32, %arg1: i32) -> (i32, i32) {
    %c0_i32 = arith.constant 0 : i32
    %c0_i32_0 = arith.constant 0 : i32
    return %arg0, %c0_i32 : i32, i32
  }
}

module attributes {stable_mosaic.version = 11 : i64} {
  func.func @_ln_lm_head_kernel(%arg0: i32, %arg1: i32, %arg2: memref<16x32xf32, #tpu.memory_space<vmem>>, %arg3: memref<1x32xf32, #tpu.memory_space<vmem>>, %arg4: memref<1x32xf32, #tpu.memory_space<vmem>>, %arg5: memref<32x128xbf16, #tpu.memory_space<vmem>>, %arg6: memref<16x128xf32, #tpu.memory_space<vmem>>, %arg7: memref<16x32xbf16, #tpu.memory_space<vmem>>) attributes {dimension_semantics = [#tpu.dimension_semantics<parallel>, #tpu.dimension_semantics<arbitrary>], iteration_bounds = array<i64: 1, 1>, scalar_prefetch = 0 : i64, scratch_operands = 1 : i64, tpu.core_type = #tpu.core_type<tc>, window_params = [{transform_indices = @transform_0, window_bounds = array<i64: 16, 32>}, {pipeline_mode = #tpu.pipeline_mode<synchronous>, transform_indices = @transform_1, window_bounds = array<i64: 1, 32>}, {pipeline_mode = #tpu.pipeline_mode<synchronous>, transform_indices = @transform_2, window_bounds = array<i64: 1, 32>}, {transform_indices = @transform_3, window_bounds = array<i64: 32, 128>}, {transform_indices = @transform_4, window_bounds = array<i64: 16, 128>}]} {
    %c0_i32 = arith.constant 0 : i32
    %0 = arith.cmpi eq, %arg1, %c0_i32 : i32
    %1 = arith.extui %0 : i1 to i32
    %c0_i32_0 = arith.constant 0 : i32
    %2 = arith.cmpi ne, %1, %c0_i32_0 : i32
    scf.if %2 {
      %c0_6 = arith.constant 0 : index
      %c0_7 = arith.constant 0 : index
      %7 = vector.load %arg2[%c0_6, %c0_7] : memref<16x32xf32, #tpu.memory_space<vmem>>, vector<16x32xf32>
      %cst_8 = arith.constant dense<0.000000e+00> : vector<16xf32>
      %8 = vector.multi_reduction <add>, %7, %cst_8 [1] : vector<16x32xf32> to vector<16xf32>
      %9 = vector.shape_cast %8 : vector<16xf32> to vector<16x1xf32>
      %cst_9 = arith.constant 3.200000e+01 : f32
      %10 = vector.broadcast %cst_9 : f32 to vector<16x1xf32>
      %11 = arith.divf %9, %10 : vector<16x1xf32>
      %12 = vector.broadcast %11 : vector<16x1xf32> to vector<16x32xf32>
      %13 = arith.subf %7, %12 : vector<16x32xf32>
      %14 = arith.mulf %13, %13 : vector<16x32xf32>
      %cst_10 = arith.constant dense<0.000000e+00> : vector<16xf32>
      %15 = vector.multi_reduction <add>, %14, %cst_10 [1] : vector<16x32xf32> to vector<16xf32>
      %16 = vector.shape_cast %15 : vector<16xf32> to vector<16x1xf32>
      %cst_11 = arith.constant 3.200000e+01 : f32
      %17 = vector.broadcast %cst_11 : f32 to vector<16x1xf32>
      %18 = arith.divf %16, %17 : vector<16x1xf32>
      %19 = vector.broadcast %11 : vector<16x1xf32> to vector<16x32xf32>
      %20 = arith.subf %7, %19 : vector<16x32xf32>
      %cst_12 = arith.constant 9.99999974E-6 : f32
      %21 = vector.broadcast %cst_12 : f32 to vector<16x1xf32>
      %22 = arith.addf %18, %21 : vector<16x1xf32>
      %23 = math.rsqrt %22 : vector<16x1xf32>
      %24 = vector.broadcast %23 : vector<16x1xf32> to vector<16x32xf32>
      %25 = arith.mulf %20, %24 : vector<16x32xf32>
      %c0_13 = arith.constant 0 : index
      %c0_14 = arith.constant 0 : index
      %26 = vector.load %arg3[%c0_13, %c0_14] : memref<1x32xf32, #tpu.memory_space<vmem>>, vector<1x32xf32>
      %27 = vector.broadcast %26 : vector<1x32xf32> to vector<16x32xf32>
      %28 = arith.mulf %25, %27 : vector<16x32xf32>
      %c0_15 = arith.constant 0 : index
      %c0_16 = arith.constant 0 : index
      %29 = vector.load %arg4[%c0_15, %c0_16] : memref<1x32xf32, #tpu.memory_space<vmem>>, vector<1x32xf32>
      %30 = vector.broadcast %29 : vector<1x32xf32> to vector<16x32xf32>
      %31 = arith.addf %28, %30 : vector<16x32xf32>
      %32 = arith.truncf %31 : vector<16x32xf32> to vector<16x32xbf16>
      %c0_17 = arith.constant 0 : index
      %c0_18 = arith.constant 0 : index
      %33 = vector.load %arg7[%c0_17, %c0_18] : memref<16x32xbf16, #tpu.memory_space<vmem>>, vector<16x32xbf16>
      tpu.vector_store %arg7[%c0_17, %c0_18], %32 {strides = array<i32>} : memref<16x32xbf16, #tpu.memory_space<vmem>>, vector<16x32xbf16>,
    } else {
    }
    %c0 = arith.constant 0 : index
    %c0_1 = arith.constant 0 : index
    %3 = vector.load %arg7[%c0, %c0_1] : memref<16x32xbf16, #tpu.memory_space<vmem>>, vector<16x32xbf16>
    %c0_2 = arith.constant 0 : index
    %c0_3 = arith.constant 0 : index
    %4 = vector.load %arg5[%c0_2, %c0_3] : memref<32x128xbf16, #tpu.memory_space<vmem>>, vector<32x128xbf16>
    %cst = arith.constant dense<0.000000e+00> : vector<16x128xf32>
    %5 = tpu.matmul %3, %4, %cst {dimension_numbers = #tpu.dot_dimension_numbers<[1], [0], [0], [1], [0, 0, 1, 1], [], []>} : vector<16x32xbf16>, vector<32x128xbf16>, vector<16x128xf32> -> vector<16x128xf32>
    %c0_4 = arith.constant 0 : index
    %c0_5 = arith.constant 0 : index
    %6 = vector.load %arg6[%c0_4, %c0_5] : memref<16x128xf32, #tpu.memory_space<vmem>>, vector<16x128xf32>
    tpu.vector_store %arg6[%c0_4, %c0_5], %5 {strides = array<i32>} : memref<16x128xf32, #tpu.memory_space<vmem>>, vector<16x128xf32>,
    return
  }
  func.func @transform_0(%arg0: i32, %arg1: i32) -> (i32, i32) {
    %c0_i32 = arith.constant 0 : i32
    %c0_i32_0 = arith.constant 0 : i32
    return %arg0, %c0_i32 : i32, i32
  }
  func.func @transform_1(%arg0: i32, %arg1: i32) -> (i32, i32) {
    %c0_i32 = arith.constant 0 : i32
    %c0_i32_0 = arith.constant 0 : i32
    %c0_i32_1 = arith.constant 0 : i32
    return %c0_i32, %c0_i32_0 : i32, i32
  }
  func.func @transform_2(%arg0: i32, %arg1: i32) -> (i32, i32) {
    %c0_i32 = arith.constant 0 : i32
    %c0_i32_0 = arith.constant 0 : i32
    %c0_i32_1 = arith.constant 0 : i32
    return %c0_i32, %c0_i32_0 : i32, i32
  }
  func.func @transform_3(%arg0: i32, %arg1: i32) -> (i32, i32) {
    %c0_i32 = arith.constant 0 : i32
    %c0_i32_0 = arith.constant 0 : i32
    return %c0_i32, %arg1 : i32, i32
  }
  func.func @transform_4(%arg0: i32, %arg1: i32) -> (i32, i32) {
    %c0_i32 = arith.constant 0 : i32
    return %arg0, %arg1 : i32, i32
  }
}

</mosaic_0001>

<bundles_post_ra>
// kernel: gpt2_lm_forward.10
= control target key start
LH: loop header
LB: loop body
LE: loop exit
PB: predicated region body
PF: predicated region fallthrough
CT: control target
= control target key end

     0   :  { %v337_v0 = vmov 0.0   ;;  %vm338_vm0 = vmmov 0   ;;  %vm56_vm1 = vcmask 261120   ;;  %vm109_vm2 = vcmask 257024   ;;  %s449_s1 = inlined_call_operand.vmem [shape: bf16[32,32], index: 1, kind: input, shape index: {}]   ;;  %s450_s2 = inlined_call_operand.vmem [shape: bf16[32,32], index: 2, kind: input, shape index: {}]   ;;  %s451_s0 = inlined_call_operand.vmem [shape: f32[16,32], index: 0, kind: input, shape index: {}]   ;;  %s452_s3 = inlined_call_operand.vmem [shape: bf16[32,32], index: 3, kind: input, shape index: {}]   ;;  %s453_s4 = inlined_call_operand.vmem [shape: f32[1,32], index: 4, kind: input, shape index: {}]   ;;  %s454_s5 = inlined_call_operand.vmem [shape: f32[1,32], index: 5, kind: input, shape index: {}]   ;;  %s455_s7 = inlined_call_operand.vmem [shape: bf16[16,32], index: 7, kind: output, shape index: {0}]   ;;  %s456_s8 = inlined_call_operand.vmem [shape: bf16[16,32], index: 8, kind: output, shape index: {1}]   ;;  %s457_s6 = inlined_call_operand.vmem [shape: f32[1,32], index: 6, kind: input, shape index: {}]   ;;  %s458_s9 = inlined_call_operand.vmem [shape: bf16[16,32], index: 9, kind: output, shape index: {2}]  }
   0x1   :  { %305 = vmatprep.subr.bf16.mxu0 %v337_v0  ;;  %v331_v1 = vld [vmem:[%s449_s1 + $0x8] sm:$0xff]   ;;  %313 = vmatprep.subr.bf16.mxu1 %v337_v0  ;;  %v333_v3 = vld [vmem:[%s449_s1] sm:$0xff]  }
   0x2   :  { %v332_v2 = vld [vmem:[%s450_s2 + $0x8] sm:$0xff]   ;;  %309 = vmatprep.mubr.msk.bf16.mxu0 %vm338_vm0, %v337_v0  ;;  %317 = vmatprep.mubr.msk.bf16.mxu1 %vm338_vm0, %v337_v0  ;;  %v30_v4 = vld [vmem:[%s451_s0] sm:$0xff] }
   0x3   :  { %306 = vmatpush3.bf16.msra.mxu0 %v331_v1  ;;  %314 = vmatpush3.bf16.msra.mxu1 %v332_v2  ;;  %v31_v5 = vld [vmem:[%s451_s0 + $0x8] sm:$0xff]  ;;  %v334_v6 = vld [vmem:[%s450_s2] sm:$0xff]  }
   0x4   :  { %307 = vmatprep.subr.bf16.mxu0 %v337_v0  ;;  %315 = vmatprep.subr.bf16.mxu1 %v337_v0  ;;  %v32_v7 = vpack.c.bf16 %v31_v5, %v30_v4  ;;  %v335_v8 = vld [vmem:[%s452_s3 + $0x8] sm:$0xff]   ;;  %v336_v9 = vld [vmem:[%s452_s3] sm:$0xff]  }
   0x5   :  { %v272_v10 = vld [vmem:[%s453_s4] ss:$0 sm:$0xff] }
   0x6   :  { %v278_v11 = vld [vmem:[%s454_s5] ss:$0 sm:$0xff] }
   0x7   :  { %308 = vmatpush3.bf16.msra.mxu0 %v333_v3  ;;  %316 = vmatpush3.bf16.msra.mxu1 %v334_v6  ;;  %v284_v25 = vld [vmem:[%s457_s6] ss:$0 sm:$0xff] }
   0x8   :  { %321 = vmatprep.subr.bf16.mxu0 %v337_v0 }
   0xa   :  { %310 = vmatmul.mubr.msk.bf16.vlgmr.msra.gmra.mxu0 %vm56_vm1, %v32_v7  ;;  %318 = vmatmul.mubr.msk.bf16.vlgmr.msra.gmra.mxu1 %vm56_vm1, %v32_v7 }
   0xb   :  { %322 = vmatpush3.bf16.msra.mxu0 %v335_v8  ;;  %325 = vmatprep.mubr.msk.bf16.mxu0 %vm338_vm0, %v337_v0 }
   0xc   :  { %323 = vmatprep.subr.bf16.mxu0 %v337_v0 }
   0xf   :  { %324 = vmatpush3.bf16.msra.mxu0 %v336_v9 }
  0x12   :  { %326 = vmatmul.mubr.msk.bf16.vlgmr.msra.gmra.mxu0 %vm56_vm1, %v32_v7 }
  0xca   :  { %v94_v12 = vpop.f32.mrf.mxu0  ;;  %v169_v14 = vpop.f32.mrf.mxu1 }
  0xcb   :  { %v95_v13 = vadd.f32 %v272_v10, %v94_v12  ;;  %v170_v16 = vadd.f32 %v278_v11, %v169_v14 }
  0xcc   :  { %v311_v15 = vpop.f32.mrf.mxu0  ;;  %v319_v18 = vpop.f32.mrf.mxu1 }
  0xcd   :  { %v290_v17 = vpack.c.bf16 %v95_v13, %v95_v13  ;;  %v292_v19 = vpack.c.bf16 %v170_v16, %v170_v16 }
  0xce   :  { %v97_v20 = vpop.f32.mrf.mxu0  ;;  %v172_v22 = vpop.f32.mrf.mxu1 }
  0xcf   :  { %110 = vst.msk [vmem:[%s455_s7] sm:$0xf] %vm109_vm2, %v290_v17  ;;  %v98_v21 = vadd.f32 %v272_v10, %v97_v20  ;;  %184 = vst.msk [vmem:[%s456_s8] sm:$0xf] %vm109_vm2, %v292_v19  ;;  %v173_v24 = vadd.f32 %v278_v11, %v172_v22 }
  0xd0   :  { %v312_v23 = vpop.f32.mrf.mxu0  ;;  %v320_v27 = vpop.f32.mrf.mxu1 }
  0xd1   :  { %v291_v26 = vpack.c.bf16 %v98_v21, %v98_v21  ;;  %v293_v28 = vpack.c.bf16 %v173_v24, %v173_v24 }
  0xd2   :  { %v243_v29 = vpop.f32.mrf.mxu0 }
  0xd3   :  { %111 = vst.msk [vmem:[%s455_s7 + $0x4] sm:$0xf] %vm109_vm2, %v291_v26  ;;  %v244_v30 = vadd.f32 %v284_v25, %v243_v29  ;;  %185 = vst.msk [vmem:[%s456_s8 + $0x4] sm:$0xf] %vm109_vm2, %v293_v28 }
  0xd4   :  { %v327_v31 = vpop.f32.mrf.mxu0 }
  0xd5   :  { %v294_v32 = vpack.c.bf16 %v244_v30, %v244_v30 }
  0xd6   :  { %v246_v33 = vpop.f32.mrf.mxu0 }
  0xd7   :  { %258 = vst.msk [vmem:[%s458_s9] sm:$0xf] %vm109_vm2, %v294_v32  ;;  %v247_v34 = vadd.f32 %v284_v25, %v246_v33 }
  0xd8   :  { %v328_v35 = vpop.f32.mrf.mxu0 }
  0xd9   :  { %v295_v36 = vpack.c.bf16 %v247_v34, %v247_v34 }
  0xdb   :  { %259 = vst.msk [vmem:[%s458_s9 + $0x4] sm:$0xf] %vm109_vm2, %v295_v36 }

// kernel: gpt2_lm_forward.12
= control target key start
LH: loop header
LB: loop body
LE: loop exit
PB: predicated region body
PF: predicated region fallthrough
CT: control target
= control target key end

     0   :  { %v124_v0 = vmov 0.0   ;;  %vm125_vm0 = vmmov 0   ;;  %vm48_vm1 = vcmask 261120   ;;  %s178_s1 = inlined_call_operand.vmem [shape: bf16[32,32], index: 1, kind: input, shape index: {}]   ;;  %s179_s0 = inlined_call_operand.vmem [shape: bf16[16,32], index: 0, kind: input, shape index: {}]   ;;  %s180_s2 = inlined_call_operand.vmem [shape: f32[1,32], index: 2, kind: input, shape index: {}]   ;;  %s181_s3 = inlined_call_operand.vmem [shape: f32[16,32], index: 3, kind: input, shape index: {}]   ;;  %s182_s4 = inlined_call_operand.vmem [shape: f32[16,32], index: 4, kind: output, shape index: {}]  }
   0x1   :  { %111 = vmatprep.subr.bf16.mxu0 %v124_v0  ;;  %v121_v1 = vld [vmem:[%s178_s1 + $0x8] sm:$0xff]   ;;  %115 = vmatprep.mubr.msk.bf16.mxu0 %vm125_vm0, %v124_v0  ;;  %v122_v2 = vld [vmem:[%s178_s1] sm:$0xff]  }
   0x2   :  { %112 = vmatpush3.bf16.msra.mxu0 %v121_v1  ;;  %v123_v3 = vld [vmem:[%s179_s0] sm:$0xff]   ;;  %v94_v11 = vld [vmem:[%s181_s3 + $0x8] sm:$0xff] }
   0x3   :  { %113 = vmatprep.subr.bf16.mxu0 %v124_v0  ;;  %v103_v4 = vld [vmem:[%s180_s2] ss:$0 sm:$0xff] }
   0x4   :  { %v93_v6 = vld [vmem:[%s181_s3] sm:$0xff] }
   0x6   :  { %114 = vmatpush3.bf16.msra.mxu0 %v122_v2 }
   0x9   :  { %116 = vmatmul.mubr.msk.bf16.vlgmr.msra.gmra.mxu0 %vm48_vm1, %v123_v3 }
  0xc9   :  { %v86_v5 = vpop.f32.mrf.mxu0 }
  0xca   :  { %v87_v7 = vadd.f32 %v103_v4, %v86_v5 }
  0xcb   :  { %v117_v8 = vpop.f32.mrf.mxu0 }
  0xcc   :  { %v95_v9 = vadd.f32 %v93_v6, %v87_v7 }
  0xcd   :  { %v89_v10 = vpop.f32.mrf.mxu0 }
  0xce   :  { %97 = vst.msk [vmem:[%s182_s4] sm:$0xff] %vm48_vm1, %v95_v9  ;;  %v90_v12 = vadd.f32 %v103_v4, %v89_v10 }
  0xcf   :  { %v118_v13 = vpop.f32.mrf.mxu0 }
  0xd0   :  { %v96_v14 = vadd.f32 %v94_v11, %v90_v12 }
  0xd2   :  { %98 = vst.msk [vmem:[%s182_s4 + $0x8] sm:$0xff] %vm48_vm1, %v96_v14 }

// kernel: gpt2_lm_forward.11
= control target key start
LH: loop header
LB: loop body
LE: loop exit
PB: predicated region body
PF: predicated region fallthrough
CT: control target
= control target key end

     0   :  { %s1001_s12 = smov 0   ;;  %s1003_s13 = smov 0   ;;  %s1127_s0 = inlined_call_operand.vmem [shape: bf16[2,8,32], index: 0, kind: input, shape index: {}]   ;;  %s1128_s1 = inlined_call_operand.vmem [shape: bf16[2,8,32], index: 1, kind: input, shape index: {}]   ;;  %s1129_s2 = inlined_call_operand.vmem [shape: bf16[2,8,32], index: 2, kind: input, shape index: {}]   ;;  %s1130_s3 = inlined_call_operand.vmem [shape: bf16[2,8,32], index: 3, kind: output, shape index: {}]  }
   0x1   :  { %s1005_s14 = smov 0  }
   0x2 LB: > { %s25_s15 = sadd.s32 1, %s967_s13  ;;  %p818_p0 = scmp.ge.s32.totalorder %s971_s14, 1  ;;  %s971_s14 = sphi %s1005_s14, %s13_s14   ;;  %s967_s13 = sphi %s1003_s13, %s1132_s13   ;;  %s963_s12 = sphi %s1001_s12, %s1131_s12  }
   0x3   : > { %p27_p1 = scmp.ge.s32.totalorder %s25_s15, 2  ;;  %p173_p2 = scmp.lt.s32.totalorder %s971_s14, 3 }
   0x5   : > { %s1134_s15 = smov (%p27_p1, %s25_s15), 0  ;;  %p174_p3 = pnand %p818_p0, %p173_p2 }
   0x6   : > { %p209_p4 = scmp.lt.s32.totalorder (!%p174_p3), %s963_s12, 1  ;;  %s975_s23 = smov (!%p174_p3), 120  }
   0x7   : > { %177 = sbr.rel (%p174_p3) target bundleno = 1420 (0x58c), region = 32  ;;  %s976_s24 = smov (!%p174_p3), 112  }
   0x8   : > { %s977_s25 = smov (!%p174_p3), 104   ;;  %s978_s29 = smov (!%p174_p3), 8  }
   0x9   : > { %s979_s30 = smov (!%p174_p3), 16   ;;  %s980_s4 = smov (!%p174_p3), 24  }
   0xc   : > { %v973_v0 = vmov 0.0   ;;  %vm974_vm0 = vmmov 0   ;;  %s1136_s12 = smov (!%p209_p4, %s963_s12), 1  ;;  %vm246_vm1 = vcmask 64512   ;;  %v239_v7 = vlaneseq }
   0xd   : > { %851 = vmatprep.subr.bf16.mxu0 %v973_v0  ;;  %853 = vmatprep.mubr.msk.bf16.mxu0 %vm974_vm0, %v973_v0  ;;  %s1025_s16 = sshll.u32 %s1136_s12, 2  ;;  %vm309_vm3 = vcmask 1043456   ;;  %vm476_vm4 = vcmask 130112   ;;  %vm593_vm5 = vcmask 195712   ;;  %vm710_vm6 = vcmask 261312  }
   0xe   : > { %857 = vmatprep.subr.bf16.mxu1 %v973_v0  ;;  %859 = vmatprep.mubr.msk.bf16.mxu1 %vm974_vm0, %v973_v0  ;;  %s219_s19 = scalar_lea.vmem %s1128_s1, %s1025_s16  ;;  %s215_s22 = scalar_lea.vmem %s1127_s0, %s1025_s16  ;;  %v1040_v8 = vshrl.u32 %v239_v7, 7  ;;  %v1042_v9 = vand.u32 127, %v239_v7  ;;  %vm714_vm7 = vcmask 257024  }
   0xf   : > { %v236_v1 = vld [vmem:[%s219_s19] sm:$0xf]  ;;  %s223_s28 = scalar_lea.vmem %s1129_s2, %s1025_s16  ;;  %s230_s7 = scalar_lea.vmem %s1130_s3, %s1025_s16 }
  0x10   : > { %v251_v2 = vsel %vm246_vm1, %v236_v1, 0  ;;  %v232_v3 = vld [vmem:[%s215_s22] sm:$0xf]  ;;  %vm245_vm2 = vcmp.le.s32.totalorder %v1042_v9, %v1040_v8  ;;  %v825_v16 = vcombine.low %v236_v1, %v236_v1 }
  0x11   : > { %852 = vmatpush3.bf16.xpose.msra.mxu0 %v251_v2  ;;  %v233_v4 = vunpack.c.l.bf16 %v232_v3  ;;  %v1060_v22 = vld [vmem:[%s223_s28] sm:$0xf] }
  0x12   : > { %869 = vmatprep.subr.bf16.mxu0 %v973_v0  ;;  %360 = vrot.lane.b32.xlu1 %v825_v16, %s975_s23  ;;  %v311_v23 = vsel %vm309_vm3, %v1060_v22, 0 }
  0x13   : > { %v234_v5 = vmul.f32 0.35355338, %v233_v4  ;;  %858 = vmatpush3.bf16.msra.mxu1 %v311_v23 }
  0x14   : > { %863 = vmatprep.subr.bf16.mxu1 %v973_v0 }
  0x15   : > { %v235_v6 = vpack.c.bf16 %v234_v5, %v234_v5 }
  0x17   : > { %355 = vrot.lane.b32.xlu1 %v235_v6, %s975_s23 }
  0x18   : > { %854 = vmatmul.mubr.msk.bf16.vlgmr.msra.gmra.mxu0 %vm246_vm1, %v235_v6 }
  0x19   : > { %871 = vmatprep.mubr.msk.bf16.mxu0 %vm974_vm0, %v973_v0 }
  0x1b   : > { %478 = vrot.lane.b32.xlu1 %v235_v6, %s976_s24 }
  0x1f   : > { %597 = vrot.lane.b32.xlu1 %v825_v16, %s977_s25 }
  0x23   : > { %595 = vrot.lane.b32.xlu1 %v235_v6, %s977_s25  ;;  %v827_v6 = vcombine.low %v1060_v22, %v1060_v22 }
  0x84   : > { %v361_v26 = vpop.permute.xlu1 %360 }
  0x85   : > { %v366_v28 = vsel %vm246_vm1, %v361_v26, 0 }
  0x89   : > { %v356_v30 = vpop.permute.xlu1 %355 }
  0x8d   : > { %v479_v32 = vpop.permute.xlu1 %478 }
  0x91   : > { %v598_v34 = vpop.permute.xlu1 %597 }
  0x92   : > { %v603_v35 = vsel %vm246_vm1, %v598_v34, 0 }
  0x95   : > { %v596_v36 = vpop.permute.xlu1 %595 }
  0xd8   : > { %v287_v10 = vpop.f32.mrf.mxu0 }
  0xd9   : > { %v293_v11 = vsel %vm245_vm2, %v287_v10, -10000.0 }
  0xda   : > { %v855_v12 = vpop.f32.mrf.mxu0  ;;  %v294_v13 = vsel %vm246_vm1, %v293_v11, -inf }
  0xdb   : > { %295 = vmax.xlane.f32.xlu0 %v294_v13 }
  0xdc   : > { %v290_v14 = vpop.f32.mrf.mxu0 }
  0xde   : > { %v856_v15 = vpop.f32.mrf.mxu0 }
 0x164   : > { %v296_v17 = vpop.xlane.xlu0 %295 }
 0x165   : > { %v297_v18 = vsub.f32 %v293_v11, %v296_v17 }
 0x167   : > { %v298_v19 = vmul.f32 1.442695, %v297_v18 }
 0x169   : > { %933 = vpow2.f32 %v298_v19 }
 0x176   : > { %v934_v20 = vpop.eup %933 }
 0x177   : > { %v300_v21 = vsel %vm246_vm1, %v934_v20, 0.0 }
 0x178   : > { %301 = vadd.xlane.f32.xlu0 %v300_v21 }
 0x18e   : > { %480 = vrot.lane.b32.xlu0 %v825_v16, %s976_s24 }
 0x201   : > { %v302_v24 = vpop.xlane.xlu0 %301 }
 0x202   : > { %935 = vrcp.f32 %v302_v24 }
 0x205   : > { %v481_v31 = vpop.permute.xlu0 %480 }
 0x206   : > { %v486_v33 = vsel %vm246_vm1, %v481_v31, 0 }
 0x20f   : > { %v936_v25 = vpop.eup %935 }
 0x210   : > { %v304_v27 = vmul.f32 %v936_v25, %v934_v20 }
 0x212   : > { %v305_v29 = vpack.c.bf16 %v304_v27, %v304_v27 }
 0x214   : > { %860 = vmatmul.mubr.msk.bf16.vlgmr.msra.gmra.mxu1 %vm246_vm1, %v305_v29 }
 0x215   : > { %864 = vmatpush3.bf16.xpose.msra.mxu1 %v366_v28  ;;  %865 = vmatprep.mubr.msk.bf16.mxu1 %vm974_vm0, %v973_v0 }
 0x216   : > { %875 = vmatprep.subr.bf16.mxu1 %v973_v0 }
 0x21c   : > { %866 = vmatmul.mubr.msk.bf16.vlgmr.msra.gmra.mxu1 %vm246_vm1, %v356_v30 }
 0x21d   : > { %876 = vmatpush3.bf16.xpose.msra.mxu1 %v486_v33  ;;  %877 = vmatprep.mubr.msk.bf16.mxu1 %vm974_vm0, %v973_v0 }
 0x21e   : > { %887 = vmatprep.subr.bf16.mxu1 %v973_v0 }
 0x224   : > { %878 = vmatmul.mubr.msk.bf16.vlgmr.msra.gmra.mxu1 %vm246_vm1, %v479_v32 }
 0x225   : > { %888 = vmatpush3.bf16.xpose.msra.mxu1 %v603_v35  ;;  %889 = vmatprep.mubr.msk.bf16.mxu1 %vm974_vm0, %v973_v0 }
 0x22c   : > { %890 = vmatmul.mubr.msk.bf16.vlgmr.msra.gmra.mxu1 %vm246_vm1, %v596_v36 }
 0x2d4   : > { %v347_v37 = vpop.f32.mrf.mxu1 }
 0x2d5   : > { %353 = vst.msk [vmem:[#allocation2] sm:$0xff] %vm246_vm1, %v347_v37 }
 0x2d6   : > { %v861_v38 = vpop.f32.mrf.mxu1 }
 0x2d8   : > { %v350_v39 = vpop.f32.mrf.mxu1 }
 0x2da   : > { %v862_v40 = vpop.f32.mrf.mxu1 }
 0x2dc   : > { %v402_v41 = vpop.f32.mrf.mxu1 }
 0x2dd   : > { %v408_v42 = vsel %vm245_vm2, %v402_v41, -10000.0 }
 0x2de   : > { %v867_v43 = vpop.f32.mrf.mxu1  ;;  %v409_v44 = vsel %vm246_vm1, %v408_v42, -inf }
 0x2df   : > { %410 = vmax.xlane.f32.xlu1 %v409_v44 }
 0x2e0   : > { %v405_v45 = vpop.f32.mrf.mxu1 }
 0x2e2   : > { %v868_v46 = vpop.f32.mrf.mxu1 }
 0x2e4   : > { %v522_v47 = vpop.f32.mrf.mxu1 }
 0x2e5   : > { %v528_v48 = vsel %vm245_vm2, %v522_v47, -10000.0 }
 0x2e6   : > { %v879_v49 = vpop.f32.mrf.mxu1  ;;  %v529_v50 = vsel %vm246_vm1, %v528_v48, -inf }
 0x2e7   : > { %530 = vmax.xlane.f32.xlu0 %v529_v50 }
 0x2e8   : > { %v525_v51 = vpop.f32.mrf.mxu1 }
 0x2ea   : > { %v880_v52 = vpop.f32.mrf.mxu1 }
 0x2ec   : > { %v639_v53 = vpop.f32.mrf.mxu1 }
 0x2ed   : > { %v645_v54 = vsel %vm245_vm2, %v639_v53, -10000.0 }
 0x2ee   : > { %v646_v55 = vsel %vm246_vm1, %v645_v54, -inf  ;;  %v891_v56 = vpop.f32.mrf.mxu1 }
 0x2ef   : > { %647 = vmax.xlane.f32.xlu1 %v646_v55 }
 0x2f0   : > { %v642_v57 = vpop.f32.mrf.mxu1 }
 0x2f2   : > { %v892_v58 = vpop.f32.mrf.mxu1 }
 0x368   : > { %v411_v59 = vpop.xlane.xlu1 %410 }
 0x369   : > { %v412_v60 = vsub.f32 %v408_v42, %v411_v59 }
 0x36b   : > { %v413_v61 = vmul.f32 1.442695, %v412_v60 }
 0x36d   : > { %937 = vpow2.f32 %v413_v61 }
 0x370   : > { %v531_v62 = vpop.xlane.xlu0 %530 }
 0x371   : > { %v532_v63 = vsub.f32 %v528_v48, %v531_v62 }
 0x373   : > { %v533_v1 = vmul.f32 1.442695, %v532_v63 }
 0x375   : > { %939 = vpow2.f32 %v533_v1 }
 0x378   : > { %v648_v7 = vpop.xlane.xlu1 %647 }
 0x379   : > { %v649_v8 = vsub.f32 %v645_v54, %v648_v7 }
 0x37a   : > { %v938_v2 = vpop.eup %937 }
 0x37b   : > { %v415_v3 = vsel %vm246_vm1, %v938_v2, 0.0  ;;  %v650_v9 = vmul.f32 1.442695, %v649_v8 }
 0x37c   : > { %416 = vadd.xlane.f32.xlu1 %v415_v3 }
 0x37d   : > { %941 = vpow2.f32 %v650_v9 }
 0x382   : > { %v940_v4 = vpop.eup %939 }
 0x383   : > { %v535_v5 = vsel %vm246_vm1, %v940_v4, 0.0 }
 0x384   : > { %536 = vadd.xlane.f32.xlu0 %v535_v5 }
 0x38a   : > { %v942_v10 = vpop.eup %941 }
 0x38b   : > { %v652_v11 = vsel %vm246_vm1, %v942_v10, 0.0 }
 0x38d   : > { %541 = vrot.lane.b32.xlu1 %v827_v6, %s976_s24 }
 0x39a   : > { %424 = vrot.lane.b32.xlu0 %v827_v6, %s975_s23 }
 0x3b1   : > { %653 = vadd.xlane.f32.xlu1 %v652_v11 }
 0x3c2   : > { %658 = vrot.lane.b32.xlu1 %v827_v6, %s977_s25 }
 0x405   : > { %v417_v12 = vpop.xlane.xlu1 %416 }
 0x406   : > { %943 = vrcp.f32 %v417_v12 }
 0x409   : > { %v542_v18 = vpop.permute.xlu1 %541 }
 0x40a   : > { %v547_v20 = vsel %vm309_vm3, %v542_v18, 0 }
 0x40d   : > { %v537_v13 = vpop.xlane.xlu0 %536 }
 0x40e   : > { %945 = vrcp.f32 %v537_v13 }
 0x411   : > { %v425_v14 = vpop.permute.xlu0 %424 }
 0x412   : > { %v430_v15 = vsel %vm309_vm3, %v425_v14, 0 }
 0x413   : > { %v944_v16 = vpop.eup %943  ;;  %870 = vmatpush3.bf16.msra.mxu0 %v430_v15 }
 0x414   : > { %881 = vmatprep.subr.bf16.mxu0 %v973_v0  ;;  %v419_v17 = vmul.f32 %v944_v16, %v938_v2 }
 0x416   : > { %v420_v19 = vpack.c.bf16 %v419_v17, %v419_v17 }
 0x418   : > { %872 = vmatmul.mubr.msk.bf16.vlgmr.msra.gmra.mxu0 %vm246_vm1, %v420_v19 }
 0x419   : > { %882 = vmatpush3.bf16.msra.mxu0 %v547_v20  ;;  %883 = vmatprep.mubr.msk.bf16.mxu0 %vm974_vm0, %v973_v0 }
 0x41a   : > { %893 = vmatprep.subr.bf16.mxu0 %v973_v0 }
 0x41b   : > { %v946_v21 = vpop.eup %945 }
 0x41c   : > { %v539_v22 = vmul.f32 %v946_v21, %v940_v4 }
 0x41e   : > { %v540_v23 = vpack.c.bf16 %v539_v22, %v539_v22 }
 0x420   : > { %884 = vmatmul.mubr.msk.bf16.vlgmr.msra.gmra.mxu0 %vm246_vm1, %v540_v23 }
 0x421   : > { %895 = vmatprep.mubr.msk.bf16.mxu0 %vm974_vm0, %v973_v0 }
 0x43a   : > { %v654_v24 = vpop.xlane.xlu1 %653 }
 0x43b   : > { %947 = vrcp.f32 %v654_v24 }
 0x43e   : > { %v659_v25 = vpop.permute.xlu1 %658 }
 0x43f   : > { %v664_v26 = vsel %vm309_vm3, %v659_v25, 0 }
 0x440   : > { %894 = vmatpush3.bf16.msra.mxu0 %v664_v26 }
 0x448   : > { %v948_v27 = vpop.eup %947 }
 0x449   : > { %v656_v28 = vmul.f32 %v948_v27, %v942_v10 }
 0x44b   : > { %v657_v29 = vpack.c.bf16 %v656_v28, %v656_v28 }
 0x44d   : > { %896 = vmatmul.mubr.msk.bf16.vlgmr.msra.gmra.mxu0 %vm246_vm1, %v657_v29 }
 0x4d8   : > { %v466_v30 = vpop.f32.mrf.mxu0 }
 0x4d9   : > { %473 = vrot.lane.b32.xlu0 %v466_v30, %s978_s29 }
 0x4da   : > { %v873_v31 = vpop.f32.mrf.mxu0 }
 0x4dc   : > { %v469_v32 = vpop.f32.mrf.mxu0 }
 0x4de   : > { %v874_v33 = vpop.f32.mrf.mxu0 }
 0x4e0   : > { %v583_v34 = vpop.f32.mrf.mxu0 }
 0x4e1   : > { %590 = vrot.lane.b32.xlu1 %v583_v34, %s979_s30 }
 0x4e2   : > { %v885_v0 = vpop.f32.mrf.mxu0 }
 0x4e4   : > { %v586_v35 = vpop.f32.mrf.mxu0 }
 0x4e6   : > { %v886_v36 = vpop.f32.mrf.mxu0 }
 0x50d   : > { %v700_v37 = vpop.f32.mrf.mxu0 }
 0x50e   : > { %707 = vrot.lane.b32.xlu0 %v700_v37, %s980_s4 }
 0x50f   : > { %v897_v38 = vpop.f32.mrf.mxu0 }
 0x511   : > { %v703_v39 = vpop.f32.mrf.mxu0 }
 0x513   : > { %v898_v40 = vpop.f32.mrf.mxu0 }
 0x54b   : > { %v474_v41 = vpop.permute.xlu0 %473 }
 0x54c   : > { %477 = vst.msk [vmem:[#allocation2] sm:$0xff] %vm476_vm4, %v474_v41 }
 0x553   : > { %v591_v42 = vpop.permute.xlu1 %590 }
 0x554   : > { %594 = vst.msk [vmem:[#allocation2] sm:$0xff] %vm593_vm5, %v591_v42 }
 0x580   : > { %v708_v43 = vpop.permute.xlu0 %707 }
 0x581   : > { %711 = vst.msk [vmem:[#allocation2] sm:$0xff] %vm710_vm6, %v708_v43 }
 0x588   : > { %v712_v44 = vld [vmem:[#allocation2] sm:$0xff] }
 0x589   : > { %v713_v45 = vpack.c.bf16 %v712_v44, %v712_v44 }
 0x58b   : > { %715 = vst.msk [vmem:[%s230_s7] sm:$0xf] %vm714_vm7, %v713_v45 }
 0x58c PF: > { %s13_s14 = sadd.s32 1, %s971_s14   ;;  %s1131_s12 = smov %s967_s13 }
 0x58d   : > { %p10_p5 = scmp.ge.s32.totalorder %s13_s14, 4   ;;  %s1132_s13 = smov %s1134_s15 }
 0x58f   :  { %12 = sbr.rel (!%p10_p5) target bundleno = 2 (0x2), region = 68 }

// kernel: gpt2_lm_forward.9
= control target key start
LH: loop header
LB: loop body
LE: loop exit
PB: predicated region body
PF: predicated region fallthrough
CT: control target
= control target key end

     0   :  { %vm33_vm0 = vcmask 261120   ;;  %v398_v15 = vmov 0.0   ;;  %vm399_vm1 = vmmov 0   ;;  %vm87_vm2 = vcmask 257024   ;;  %s505_s0 = inlined_call_operand.vmem [shape: f32[16,32], index: 0, kind: input, shape index: {}]   ;;  %s506_s3 = inlined_call_operand.vmem [shape: bf16[32,128], index: 3, kind: input, shape index: {}]   ;;  %s507_s1 = inlined_call_operand.vmem [shape: f32[1,32], index: 1, kind: input, shape index: {}]   ;;  %s508_s2 = inlined_call_operand.vmem [shape: f32[1,32], index: 2, kind: input, shape index: {}]   ;;  %s509_s5 = inlined_call_operand.vmem [shape: bf16[128,32], index: 5, kind: input, shape index: {}]   ;;  %s510_s4 = inlined_call_operand.vmem [shape: f32[1,128], index: 4, kind: input, shape index: {}]   ;;  %s511_s6 = inlined_call_operand.vmem [shape: f32[1,32], index: 6, kind: input, shape index: {}]   ;;  %s512_s7 = inlined_call_operand.vmem [shape: f32[16,32], index: 7, kind: output, shape index: {}]  }
   0x1   :  { %v31_v0 = vld [vmem:[%s505_s0] sm:$0xff]  ;;  %v32_v1 = vld [vmem:[%s505_s0 + $0x8] sm:$0xff]  ;;  %349 = vmatprep.subr.bf16.mxu0 %v398_v15  ;;  %90 = vst.msk [vmem:[#allocation2] sm:$0xff] %vm33_vm0, %v398_v15  ;;  %91 = vst.msk [vmem:[#allocation2 + $0x8] sm:$0xff] %vm33_vm0, %v398_v15  ;;  %357 = vmatprep.subr.bf16.mxu1 %v398_v15 }
   0x2   :  { %v34_v2 = vsel %vm33_vm0, %v31_v0, 0.0  ;;  %v37_v3 = vsel %vm33_vm0, %v32_v1, 0.0  ;;  %v379_v14 = vld [vmem:[%s506_s3 + $0x8] sm:$0xff]   ;;  %v380_v16 = vld [vmem:[%s506_s3] sm:$0xff]   ;;  %353 = vmatprep.mubr.msk.bf16.mxu0 %vm399_vm1, %v398_v15  ;;  %373 = vmatprep.mubr.msk.bf16.mxu1 %vm399_vm1, %v398_v15  ;;  %v382_v36 = vld [vmem:[%s509_s5 + $0x38] sm:$0xff]  }
   0x3   :  { %35 = vadd.xlane.f32.xlu0 %v34_v2  ;;  %350 = vmatpush3.bf16.msra.mxu0 %v379_v14  ;;  %v317_v24 = vld [vmem:[%s507_s1] ss:$0 sm:$0xff]  ;;  %v383_v37 = vld [vmem:[%s509_s5 + $0x30] sm:$0xff]   ;;  %v384_v38 = vld [vmem:[%s509_s5 + $0x28] sm:$0xff]  }
   0x4   :  { %351 = vmatprep.subr.bf16.mxu0 %v398_v15  ;;  %v318_v26 = vld [vmem:[%s508_s2] ss:$0 sm:$0xff]  ;;  %358 = vmatpush3.bf16.msra.mxu1 %v382_v36  ;;  %v386_v40 = vld [vmem:[%s509_s5 + $0x18] sm:$0xff]   ;;  %v387_v41 = vld [vmem:[%s509_s5 + $0x10] sm:$0xff]  }
   0x5   :  { %359 = vmatprep.subr.bf16.mxu1 %v398_v15  ;;  %v385_v39 = vld [vmem:[%s509_s5 + $0x20] sm:$0xff]   ;;  %v388_v42 = vld [vmem:[%s509_s5 + $0x8] sm:$0xff]  }
   0x6   :  { %v389_v43 = vld [vmem:[%s509_s5] sm:$0xff]  }
   0x7   :  { %38 = vadd.xlane.f32.xlu0 %v37_v3  ;;  %352 = vmatpush3.bf16.msra.mxu0 %v380_v16  ;;  %v321_v44 = vld [vmem:[%s510_s4] ss:$0 sm:$0xff] }
   0x8   :  { %360 = vmatpush3.bf16.msra.mxu1 %v383_v37  ;;  %v334_v14 = vld [vmem:[%s511_s6] ss:$0 sm:$0xff] }
   0x9   :  { %361 = vmatprep.subr.bf16.mxu1 %v398_v15 }
   0xc   :  { %362 = vmatpush3.bf16.msra.mxu1 %v384_v38 }
   0xd   :  { %363 = vmatprep.subr.bf16.mxu1 %v398_v15 }
  0x10   :  { %364 = vmatpush3.bf16.msra.mxu1 %v385_v39 }
  0x11   :  { %365 = vmatprep.subr.bf16.mxu1 %v398_v15 }
  0x14   :  { %366 = vmatpush3.bf16.msra.mxu1 %v386_v40 }
  0x15   :  { %367 = vmatprep.subr.bf16.mxu1 %v398_v15 }
  0x18   :  { %368 = vmatpush3.bf16.msra.mxu1 %v387_v41 }
  0x19   :  { %369 = vmatprep.subr.bf16.mxu1 %v398_v15 }
  0x1c   :  { %370 = vmatpush3.bf16.msra.mxu1 %v388_v42 }
  0x1d   :  { %371 = vmatprep.subr.bf16.mxu1 %v398_v15 }
  0x20   :  { %372 = vmatpush3.bf16.msra.mxu1 %v389_v43 }
  0x8c   :  { %v36_v4 = vpop.xlane.xlu0 %35 }
  0x8d   :  { %v41_v5 = vmul.f32 0.03125, %v36_v4 }
  0x8f   :  { %v43_v6 = vsub.f32 %v31_v0, %v41_v5 }
  0x90   :  { %v39_v7 = vpop.xlane.xlu0 %38 }
  0x91   :  { %v42_v8 = vmul.f32 0.03125, %v39_v7  ;;  %v45_v9 = vmul.f32 %v43_v6, %v43_v6 }
  0x93   :  { %v44_v10 = vsub.f32 %v32_v1, %v42_v8  ;;  %v47_v11 = vsel %vm33_vm0, %v45_v9, 0.0 }
  0x94   :  { %48 = vadd.xlane.f32.xlu1 %v47_v11 }
  0x95   :  { %v46_v12 = vmul.f32 %v44_v10, %v44_v10 }
  0x97   :  { %v50_v13 = vsel %vm33_vm0, %v46_v12, 0.0 }
  0x98   :  { %51 = vadd.xlane.f32.xlu1 %v50_v13 }
 0x11d   :  { %v49_v17 = vpop.xlane.xlu1 %48 }
 0x11e   :  { %v53_v18 = vmul.f32 0.03125, %v49_v17 }
 0x120   :  { %v55_v19 = vadd.f32 1e-05, %v53_v18 }
 0x121   :  { %v52_v20 = vpop.xlane.xlu1 %51 }
 0x122   :  { %390 = vrsqrt.f32 %v55_v19  ;;  %v54_v21 = vmul.f32 0.03125, %v52_v20 }
 0x124   :  { %v56_v22 = vadd.f32 1e-05, %v54_v21 }
 0x126   :  { %392 = vrsqrt.f32 %v56_v22 }
 0x12f   :  { %v391_v23 = vpop.eup %390 }
 0x130   :  { %v59_v25 = vmul.f32 %v391_v23, %v43_v6  ;;  %v185_v6 = vld [vmem:[#allocation2] sm:$0xff] }
 0x132   :  { %v68_v27 = vmul.f32 %v317_v24, %v59_v25 }
 0x133   :  { %v393_v28 = vpop.eup %392 }
 0x134   :  { %v77_v29 = vadd.f32 %v318_v26, %v68_v27  ;;  %v60_v30 = vmul.f32 %v393_v28, %v44_v10  ;;  %v186_v10 = vld [vmem:[#allocation2 + $0x8] sm:$0xff] }
 0x136   :  { %v335_v31 = vpack.c.bf16 %v77_v29, %v77_v29  ;;  %v69_v32 = vmul.f32 %v317_v24, %v60_v30 }
 0x138   :  { %88 = vst.msk [vmem:[#allocation3] sm:$0xf] %vm87_vm2, %v335_v31  ;;  %v78_v33 = vadd.f32 %v318_v26, %v69_v32 }
 0x13a   :  { %v336_v34 = vpack.c.bf16 %v78_v33, %v78_v33 }
 0x13c   :  { %89 = vst.msk [vmem:[#allocation3 + $0x4] sm:$0xf] %vm87_vm2, %v336_v34 }
 0x143   :  { %v381_v35 = vld [vmem:[#allocation3] sm:$0xff]  }
 0x144   :  { %354 = vmatmul.mubr.msk.bf16.vlgmr.msra.gmra.mxu0 %vm33_vm0, %v381_v35 }
 0x204   :  { %v160_v45 = vpop.f32.mrf.mxu0 }
 0x205   :  { %v161_v46 = vadd.f32 %v321_v44, %v160_v45 }
 0x206   :  { %v355_v47 = vpop.f32.mrf.mxu0 }
 0x207   :  { %v169_v48 = vmul.f32 %v161_v46, %v161_v46  ;;  %v167_v0 = vmul.f32 0.5, %v161_v46 }
 0x208   :  { %v163_v49 = vpop.f32.mrf.mxu0 }
 0x209   :  { %v171_v50 = vmul.f32 %v169_v48, %v161_v46  ;;  %v164_v51 = vadd.f32 %v321_v44, %v163_v49 }
 0x20a   :  { %v356_v52 = vpop.f32.mrf.mxu0 }
 0x20b   :  { %v173_v53 = vmul.f32 0.044715, %v171_v50  ;;  %v170_v54 = vmul.f32 %v164_v51, %v164_v51  ;;  %v168_v1 = vmul.f32 0.5, %v164_v51 }
 0x20d   :  { %v175_v55 = vadd.f32 %v173_v53, %v161_v46  ;;  %v172_v56 = vmul.f32 %v170_v54, %v164_v51 }
 0x20f   :  { %v177_v57 = vmul.f32 0.7978846, %v175_v55  ;;  %v174_v58 = vmul.f32 0.044715, %v172_v56 }
 0x211   :  { %394 = vtanh.f32 %v177_v57  ;;  %v176_v59 = vadd.f32 %v174_v58, %v164_v51 }
 0x213   :  { %v178_v60 = vmul.f32 0.7978846, %v176_v59 }
 0x215   :  { %396 = vtanh.f32 %v178_v60 }
 0x21e   :  { %v395_v61 = vpop.eup %394 }
 0x21f   :  { %v181_v62 = vadd.f32 1.0, %v395_v61 }
 0x221   :  { %v183_v3 = vmul.f32 %v181_v62, %v167_v0 }
 0x222   :  { %v397_v63 = vpop.eup %396 }
 0x223   :  { %v182_v2 = vadd.f32 1.0, %v397_v63 }
 0x225   :  { %v184_v4 = vmul.f32 %v182_v2, %v168_v1 }
 0x227   :  { %v187_v5 = vpack.c.bf16 %v184_v4, %v183_v3 }
 0x229   :  { %374 = vmatmul.mubr.bf16.vlgmr.msra.gmra.mxu1 %v187_v5 }
 0x2e9   :  { %v286_v7 = vpop.f32.mrf.mxu1 }
 0x2ea   :  { %v293_v8 = vadd.f32 %v286_v7, %v185_v6 }
 0x2eb   :  { %v375_v9 = vpop.f32.mrf.mxu1 }
 0x2ec   :  { %295 = vst.msk [vmem:[#allocation2] sm:$0xff] %vm33_vm0, %v293_v8 }
 0x2ed   :  { %v289_v11 = vpop.f32.mrf.mxu1 }
 0x2ee   :  { %v294_v12 = vadd.f32 %v289_v11, %v186_v10 }
 0x2ef   :  { %v376_v13 = vpop.f32.mrf.mxu1 }
 0x2f0   :  { %296 = vst.msk [vmem:[#allocation2 + $0x8] sm:$0xff] %vm33_vm0, %v294_v12 }
 0x2f3   :  { %v300_v15 = vld [vmem:[#allocation2] sm:$0xff] }
 0x2f4   :  { %v309_v16 = vadd.f32 %v334_v14, %v300_v15 }
 0x2f6   :  { %311 = vst.msk [vmem:[%s512_s7] sm:$0xff] %vm33_vm0, %v309_v16 }
 0x2f7   :  { %v301_v17 = vld [vmem:[#allocation2 + $0x8] sm:$0xff] }
 0x2f8   :  { %v310_v18 = vadd.f32 %v334_v14, %v301_v17 }
 0x2fa   :  { %312 = vst.msk [vmem:[%s512_s7 + $0x8] sm:$0xff] %vm33_vm0, %v310_v18 }

// kernel: gpt2_lm_forward.17
= control target key start
LH: loop header
LB: loop body
LE: loop exit
PB: predicated region body
PF: predicated region fallthrough
CT: control target
= control target key end

     0   :  { %vm25_vm0 = vcmask 261120   ;;  %s279_s0 = inlined_call_operand.vmem [shape: f32[16,32], index: 0, kind: input, shape index: {}]   ;;  %s280_s1 = inlined_call_operand.vmem [shape: f32[1,32], index: 1, kind: input, shape index: {}]   ;;  %s281_s2 = inlined_call_operand.vmem [shape: f32[1,32], index: 2, kind: input, shape index: {}]   ;;  %s282_s3 = inlined_call_operand.vmem [shape: bf16[32,128], index: 3, kind: input, shape index: {}]   ;;  %s283_s4 = inlined_call_operand.hbm [shape: f32[16,128], index: 4, kind: output, shape index: {}]  }
   0x1   :  { %v23_v0 = vld [vmem:[%s279_s0] sm:$0xff]  ;;  %v24_v1 = vld [vmem:[%s279_s0 + $0x8] sm:$0xff] }
   0x2   :  { %v26_v2 = vsel %vm25_vm0, %v23_v0, 0.0 }
   0x3   :  { %27 = vadd.xlane.f32.xlu0 %v26_v2 }
   0x4   :  { %9 = vsyncpa [#allocation4], 0  ;;  %v29_v3 = vsel %vm25_vm0, %v24_v1, 0.0  ;;  %v194_v14 = vld [vmem:[%s282_s3 + $0x8] sm:$0xff]   ;;  %v223_v15 = vmov 0.0   ;;  %vm224_vm1 = vmmov 0  }
   0x5   :  { %181 = vmatprep.subr.bf16.mxu0 %v223_v15  ;;  %185 = vmatprep.mubr.msk.bf16.mxu0 %vm224_vm1, %v223_v15  ;;  %v195_v16 = vld [vmem:[%s282_s3] sm:$0xff]   ;;  %vm79_vm2 = vcmask 257024  }
   0x6   :  { %182 = vmatpush3.bf16.msra.mxu0 %v194_v14  ;;  %v168_v24 = vld [vmem:[%s280_s1] ss:$0 sm:$0xff]  ;;  %s225_s1 = smov [#allocation3]  }
   0x7   :  { %30 = vadd.xlane.f32.xlu0 %v29_v3  ;;  %183 = vmatprep.subr.bf16.mxu0 %v223_v15  ;;  %v169_v26 = vld [vmem:[%s281_s2] ss:$0 sm:$0xff]  ;;  %s157_s3 = sshll.u32 %s225_s1, 4  ;;  %s158_s3 = int_to_ptr.vmem [resolvable:$true] %s157_s3 }
   0x8   :  { %s201_s2 = scalar_lea.vmem %s158_s3, 256  ;;  %p206_p1 = scmp.lt.s32.totalorder %s158_s3, %s158_s3 }
   0x9   :  { %p202_p0 = scmp.ne.s32.totalorder %s158_s3, %s201_s2  ;;  %p207_p2 = scmp.lt.s32.totalorder %s201_s2, %s201_s2 }
   0xa   :  { %184 = vmatpush3.bf16.msra.mxu0 %v195_v16 }
   0xb   :  { %p208_p3 = por %p207_p2, %p206_p1 }
   0xd   :  { %p209_p4 = pnand %p208_p3, %p202_p0 }
  0x8c   :  { %v28_v4 = vpop.xlane.xlu0 %27 }
  0x8d   :  { %v33_v5 = vmul.f32 0.03125, %v28_v4 }
  0x8f   :  { %v35_v6 = vsub.f32 %v23_v0, %v33_v5 }
  0x90   :  { %v31_v7 = vpop.xlane.xlu0 %30 }
  0x91   :  { %v34_v8 = vmul.f32 0.03125, %v31_v7  ;;  %v37_v9 = vmul.f32 %v35_v6, %v35_v6 }
  0x93   :  { %v36_v10 = vsub.f32 %v24_v1, %v34_v8  ;;  %v39_v11 = vsel %vm25_vm0, %v37_v9, 0.0 }
  0x94   :  { %40 = vadd.xlane.f32.xlu1 %v39_v11 }
  0x95   :  { %v38_v12 = vmul.f32 %v36_v10, %v36_v10 }
  0x97   :  { %v42_v13 = vsel %vm25_vm0, %v38_v12, 0.0 }
  0x98   :  { %43 = vadd.xlane.f32.xlu1 %v42_v13 }
 0x11d   :  { %v41_v17 = vpop.xlane.xlu1 %40 }
 0x11e   :  { %v45_v18 = vmul.f32 0.03125, %v41_v17 }
 0x120   :  { %v47_v19 = vadd.f32 1e-05, %v45_v18 }
 0x121   :  { %v44_v20 = vpop.xlane.xlu1 %43 }
 0x122   :  { %197 = vrsqrt.f32 %v47_v19  ;;  %v46_v21 = vmul.f32 0.03125, %v44_v20 }
 0x124   :  { %v48_v22 = vadd.f32 1e-05, %v46_v21 }
 0x126   :  { %199 = vrsqrt.f32 %v48_v22 }
 0x12f   :  { %v198_v23 = vpop.eup %197 }
 0x130   :  { %v51_v25 = vmul.f32 %v198_v23, %v35_v6 }
 0x132   :  { %v60_v27 = vmul.f32 %v168_v24, %v51_v25 }
 0x133   :  { %v200_v28 = vpop.eup %199 }
 0x134   :  { %v69_v29 = vadd.f32 %v169_v26, %v60_v27  ;;  %v52_v30 = vmul.f32 %v200_v28, %v36_v10 }
 0x136   :  { %v176_v31 = vpack.c.bf16 %v69_v29, %v69_v29  ;;  %v61_v32 = vmul.f32 %v168_v24, %v52_v30 }
 0x138   :  { %80 = vst.msk [vmem:[#allocation2] sm:$0xf] %vm79_vm2, %v176_v31  ;;  %v70_v33 = vadd.f32 %v169_v26, %v61_v32 }
 0x13a   :  { %v177_v34 = vpack.c.bf16 %v70_v33, %v70_v33 }
 0x13c   :  { %81 = vst.msk [vmem:[#allocation2 + $0x4] sm:$0xf] %vm79_vm2, %v177_v34 }
 0x143   :  { %v196_v35 = vld [vmem:[#allocation2] sm:$0xff]  }
 0x144   :  { %186 = vmatmul.mubr.msk.bf16.vlgmr.msra.gmra.mxu0 %vm25_vm0, %v196_v35 }
 0x204   :  { %v143_v36 = vpop.f32.mrf.mxu0 }
 0x205   :  { %150 = vst [vmem:[#allocation3] sm:$0xff] %v143_v36 }
 0x206   :  { %v187_v37 = vpop.f32.mrf.mxu0 }
 0x208   :  { %v146_v38 = vpop.f32.mrf.mxu0 }
 0x209   :  { %151 = vst [vmem:[#allocation3 + $0x8] sm:$0xff] %v146_v38 }
 0x20a   :  { %v188_v39 = vpop.f32.mrf.mxu0 }
 0x20b   :  { %212 = shalt.err (!%p209_p4)
}
 0x20c   :  { %s226_s26 = smov 128   ;;  %s227_s27 = smov 8  }
 0x20d   :  { %163 = dma.vmem_to_hbm [thread:$0]  %s158_s3, 256, %s283_s4, [#allocation4], %s226_s26, %s226_s26, %s227_s27  }
 0x20e   :  { %221 = dma.done.wait [#allocation4], 256  }
 0x20f   :  { %222 = vsyncadd [#allocation4], 4294967040 }
 0x210   :  { %167 = vsyncpa [#allocation4], 1 }

</bundles_post_ra>
